<compile_context>
chip_gen: v5e
topology: v5e:2x2
jax: 0.10.0
libtpu: 0.0.40
codegen_flags: <defaults>
</compile_context>

<pallas_src>
import math

import numpy as np

import jax
import jax.numpy as jnp
from jax.experimental import pallas as pl
from jax.experimental.pallas import tpu as pltpu

INPUT_SIZE = 32
OUTPUT_SIZE = 8
NUM_HEADS = 2
HEAD_DIM = INPUT_SIZE // NUM_HEADS   # 16
SEQ = 8                              # attention sequence length per independent sample
DEFAULT_TILE_ROWS = 512              # rows per grid step (64 sequences)
ATTN_CHUNK_ROWS = 128                # rows per in-kernel attention chunk (16 sequences)


def _residual_network_kernel(
    x_ref, bias_ref, norm_ref, wqkv_ref, bqkv_ref, wo_ref, bo_ref,
    rw1_ref, rb1_ref, rw2_ref, rb2_ref, rw3_ref, rb3_ref,
    w4_ref, b4_ref, w5_ref, b5_ref,
    o_ref,
    attn_scratch,
):
    f32 = jnp.float32
    mm = wqkv_ref.dtype                        # matmul-operand dtype (f32 or bf16)
    tile_rows = x_ref.shape[0]                 # static
    chunk = bias_ref.shape[0]                  # static (<= 128 rows)
    n_chunks = tile_rows // chunk
    E, Hd = INPUT_SIZE, HEAD_DIM

    # Process the tile in 128-row chunks so the (chunk, chunk) attention
    # score/prob temporaries stay bounded regardless of tile size.
    @pl.loop(0, n_chunks)
    def _(c):
        r0 = pl.multiple_of(c * chunk, chunk)
        rows = pl.ds(r0, chunk)

        # --- FeatureWiseNormalization: (x - mean) * (1/std), 1/std precomputed ---
        nm = norm_ref[...]                                     # (2, 32)
        xc = (x_ref[rows, :] - nm[0:1, :]) * nm[1:2, :]        # (chunk, 32) f32
        xm = xc.astype(mm)

        # --- AttentionLayer: x = x + MultiheadAttention(x, x, x), per-sequence ---
        # Fused QKV projection: one (chunk,32)x(32,96) matmul + one bias add.
        # The 1/sqrt(head_dim) scale is already folded into the Q columns.
        qkv = jnp.dot(xm, wqkv_ref[...], preferred_element_type=f32) + bqkv_ref[...]

        for h in range(NUM_HEADS):                             # static unroll (2 heads)
            qh = qkv[:, h * Hd:(h + 1) * Hd]                   # (chunk, 16)
            kh = qkv[:, E + h * Hd:E + (h + 1) * Hd]
            vh = qkv[:, 2 * E + h * Hd:2 * E + (h + 1) * Hd]

            # scores + precomputed block-diagonal additive mask (same-sequence only)
            s = jax.lax.dot_general(qh.astype(mm), kh.astype(mm),
                                    (((1,), (1,)), ((), ())),
                                    preferred_element_type=f32)        # (chunk, chunk)
            s = s + bias_ref[...]
            s = s - jnp.max(s, axis=-1, keepdims=True)                 # stable softmax
            p = jnp.exp(s)
            p = p * pl.reciprocal(jnp.sum(p, axis=-1, keepdims=True), approx=True)

            ctx = jnp.dot(p.astype(mm), vh.astype(mm),
                          preferred_element_type=f32)                  # (chunk, 16)
            proj = jnp.dot(ctx.astype(mm), wo_ref[h],
                           preferred_element_type=f32)                 # (chunk, 32)
            # Accumulate through VMEM scratch: bounds each head's score/prob
            # live ranges (the vreg file is 64 vregs; two live (128,128) f32
            # score+prob pairs would already fill it).
            if h == 0:
                attn_scratch[...] = proj
            else:
                attn_scratch[...] = attn_scratch[...] + proj

        xa = xc + attn_scratch[...] + bo_ref[...]

        # --- ResidualBlock(32, [64, 32]) followed by ReLU ---
        h1 = jnp.maximum(
            jnp.dot(xa.astype(mm), rw1_ref[...], preferred_element_type=f32) + rb1_ref[...], 0.0)
        h2 = jnp.maximum(
            jnp.dot(h1.astype(mm), rw2_ref[...], preferred_element_type=f32) + rb2_ref[...], 0.0)
        h3 = jnp.dot(h2.astype(mm), rw3_ref[...], preferred_element_type=f32) + rb3_ref[...]
        xr = jnp.maximum(h3 + xa, 0.0)

        # --- Linear(32, 32) + ReLU ---
        x4 = jnp.maximum(
            jnp.dot(xr.astype(mm), w4_ref[...], preferred_element_type=f32) + b4_ref[...], 0.0)

        # --- Final Linear(32, 8), no final activation ---
        # 8-lane output -> masked partial stores; lane-dense packing not worth the
        # relayout at this width.
        o_ref[rows, :] = (
            jnp.dot(x4.astype(mm), w5_ref[...], preferred_element_type=f32) + b5_ref[...])


def residual_network_forward(x, params, *, tile_rows=DEFAULT_TILE_ROWS,
                             attn_chunk_rows=ATTN_CHUNK_ROWS,
                             matmul_dtype=jnp.float32):
    n_rows, feat = x.shape
    assert feat == INPUT_SIZE
    assert n_rows % SEQ == 0, "rows must pack whole length-SEQ sequences"
    num_seqs = n_rows // SEQ

    # Tile selection: whole sequences per tile, tile divides the batch, tile is a
    # multiple of the attention chunk.
    tile_seqs = max(1, min(tile_rows // SEQ, num_seqs))
    while num_seqs % tile_seqs != 0:
        tile_seqs -= 1
    tile_rows = tile_seqs * SEQ
    chunk_seqs = max(1, min(attn_chunk_rows // SEQ, tile_seqs))
    while tile_seqs % chunk_seqs != 0:
        chunk_seqs -= 1
    chunk_rows = chunk_seqs * SEQ
    grid = (n_rows // tile_rows,)

    # Precomputed block-diagonal additive attention bias (hoisted out of kernel):
    # 0 where rows belong to the same length-SEQ sequence, -1e30 elsewhere.
    seq_id = np.arange(chunk_rows) // SEQ
    bias = jnp.asarray(
        np.where(seq_id[:, None] == seq_id[None, :], 0.0, -1e30).astype(np.float32))

    (norm, wqkv, bqkv, wo, bo,
     rw1, rb1, rw2, rb2, rw3, rb3, w4, b4, w5, b5) = params
    mm = jnp.dtype(matmul_dtype)
    # Matmul weights in the requested matmul dtype; biases/norm/mask stay f32.
    wqkv_m, wo_m, rw1_m, rw2_m, rw3_m, w4_m, w5_m = (
        p.astype(mm) for p in (wqkv, wo, rw1, rw2, rw3, w4, w5))

    ops = [bias, norm, wqkv_m, bqkv, wo_m, bo,
           rw1_m, rb1, rw2_m, rb2, rw3_m, rb3, w4_m, b4, w5_m, b5]

    def resident(p):
        # Whole array resident in VMEM; constant block index -> DMA'd once, reused.
        return pl.BlockSpec(p.shape, lambda b, _n=p.ndim: (0,) * _n)

    in_specs = [pl.BlockSpec((tile_rows, INPUT_SIZE), lambda b: (b, 0))]
    in_specs += [resident(p) for p in ops]

    # ~37 KFLOP / 160 B / 256 exps per row (masked 128-wide softmax is 16x the
    # mathematically necessary exp count; documented scheduling hint for XLA).
    cost = pl.CostEstimate(flops=37_000 * n_rows,
                           transcendentals=256 * n_rows,
                           bytes_accessed=160 * n_rows)

    return pl.pallas_call(
        _residual_network_kernel,
        out_shape=jax.ShapeDtypeStruct((n_rows, OUTPUT_SIZE), jnp.float32),
        grid=grid,
        in_specs=in_specs,
        out_specs=pl.BlockSpec((tile_rows, OUTPUT_SIZE), lambda b: (b, 0)),
        scratch_shapes=[pltpu.VMEM((chunk_rows, INPUT_SIZE), jnp.float32)],
        compiler_params=pltpu.CompilerParams(
            dimension_semantics=("parallel",),     # shard batch axis across TCs
            vmem_limit_bytes=32 * 1024 * 1024,     # safe on v5e/v6e/v7x; usage is tiny
        ),
        cost_estimate=cost,
    )(x, *ops)


def init_params(key):
    """Deterministic synthetic parameters, re-laid-out for the kernel.

    Layout mirrors the nn.Module: MultiheadAttention's fused in_proj (3E, E) is kept
    fused as a single (E, 3E) pre-transposed weight with the 1/sqrt(head_dim) scale
    folded into the Q columns; out_proj is split into per-head (head_dim, E) slabs;
    Linear weights are stored pre-transposed as (in, out); std is stored as 1/std.
    """
    ks = jax.random.split(key, 16)

    def w(k, shape, scale=0.1):
        return scale * jax.random.normal(k, shape, jnp.float32)

    # FeatureWiseNormalization
    mean = w(ks[0], (INPUT_SIZE,))
    std = jax.random.uniform(ks[1], (INPUT_SIZE,), jnp.float32, 0.5, 1.5)
    norm = jnp.stack([mean, 1.0 / std], axis=0)                    # (2, 32)

    # MultiheadAttention(embed=32, heads=2), PyTorch layouts:
    in_w = w(ks[2], (3 * INPUT_SIZE, INPUT_SIZE))                  # in_proj_weight (3E, E)
    in_b = w(ks[3], (3 * INPUT_SIZE,))                             # in_proj_bias
    out_w = w(ks[4], (INPUT_SIZE, INPUT_SIZE))                     # out_proj.weight (E, E)
    out_b = w(ks[5], (INPUT_SIZE,))                                # out_proj.bias

    scale = 1.0 / math.sqrt(HEAD_DIM)
    # Fused (in, out) QKV weight; output columns are [Qh0|Qh1|Kh0|Kh1|Vh0|Vh1].
    wqkv = in_w.T                                                  # (32, 96)
    wqkv = wqkv.at[:, :INPUT_SIZE].multiply(scale)                 # fold 1/sqrt(Hd) into Q
    bqkv = in_b.reshape(1, 3 * INPUT_SIZE)
    bqkv = bqkv.at[:, :INPUT_SIZE].multiply(scale)

    # out-proj per head: wo[h][d, e] = out_w[e, h*Hd + d]
    wo = out_w.reshape(INPUT_SIZE, NUM_HEADS, HEAD_DIM).transpose(1, 2, 0)   # (2, 16, 32)
    bo = out_b.reshape(1, INPUT_SIZE)                              # (1, 32)

    # ResidualBlock(32, [64, 32]): Linear(32,64), Linear(64,32), Linear(32,32)
    rw1 = w(ks[6], (INPUT_SIZE, 64)); rb1 = w(ks[7], (1, 64))
    rw2 = w(ks[8], (64, 32));         rb2 = w(ks[9], (1, 32))
    rw3 = w(ks[10], (32, INPUT_SIZE)); rb3 = w(ks[11], (1, INPUT_SIZE))

    # Linear(32, 32) and Linear(32, 8)
    w4 = w(ks[12], (INPUT_SIZE, INPUT_SIZE)); b4 = w(ks[13], (1, INPUT_SIZE))
    w5 = w(ks[14], (INPUT_SIZE, OUTPUT_SIZE)); b5 = w(ks[15], (1, OUTPUT_SIZE))

    return [norm, wqkv, bqkv, wo, bo,
            rw1, rb1, rw2, rb2, rw3, rb3, w4, b4, w5, b5]


def residual_network_reference(x, params):
    """Pure-JAX reference of the module's forward pass (same param layout)."""
    (norm, wqkv, bqkv, wo, bo,
     rw1, rb1, rw2, rb2, rw3, rb3, w4, b4, w5, b5) = params
    E, Hd = INPUT_SIZE, HEAD_DIM
    x = (x - norm[0:1, :]) * norm[1:2, :]
    num_seqs = x.shape[0] // SEQ
    xs = x.reshape(num_seqs, SEQ, E)
    qkv = xs @ wqkv + bqkv                     # Q columns already scaled by 1/sqrt(Hd)
    attn = jnp.zeros_like(xs)
    for h in range(NUM_HEADS):
        q = qkv[..., h * Hd:(h + 1) * Hd]
        k = qkv[..., E + h * Hd:E + (h + 1) * Hd]
        v = qkv[..., 2 * E + h * Hd:2 * E + (h + 1) * Hd]
        s = jnp.einsum("bqd,bkd->bqk", q, k)
        p = jax.nn.softmax(s, axis=-1)
        attn = attn + jnp.einsum("bqk,bkd->bqd", p, v) @ wo[h]
    xs = xs + attn + bo
    x = xs.reshape(num_seqs * SEQ, E)
    h1 = jax.nn.relu(x @ rw1 + rb1)
    h2 = jax.nn.relu(h1 @ rw2 + rb2)
    x = jax.nn.relu(h2 @ rw3 + rb3 + x)
    x = jax.nn.relu(x @ w4 + b4)
    return x @ w5 + b5


if __name__ == "__main__":
    key = jax.random.PRNGKey(0)
    k_params, k_x = jax.random.split(key)
    params = init_params(k_params)

    num_seqs = 256                                     # 256 independent length-8 sequences
    x = jax.random.normal(k_x, (num_seqs * SEQ, INPUT_SIZE), jnp.float32)   # (2048, 32)

    ref = jax.block_until_ready(residual_network_reference(x, params))

    # f32 matmul operands (matches PyTorch numerics); grid = (4,) of 512-row tiles,
    # attention chunked at 128 rows inside each tile.
    out = jax.block_until_ready(residual_network_forward(x, params))
    assert out.shape == (num_seqs * SEQ, OUTPUT_SIZE) and out.dtype == jnp.float32
    np.testing.assert_allclose(np.asarray(out), np.asarray(ref), rtol=3e-2, atol=3e-3)

    # bf16 matmul operands (v6e/v7x MXU-native path); softmax/elementwise stay f32.
    # The strict correctness guard is the f32 check above; this is a sanity check.
    out_bf16 = jax.block_until_ready(
        residual_network_forward(x, params, matmul_dtype=jnp.bfloat16))
    np.testing.assert_allclose(np.asarray(out_bf16), np.asarray(ref), rtol=5e-2, atol=2e-2)

    print("KERNEL_OK")
</pallas_src>

<mosaic_0001>
module attributes {stable_mosaic.version = 11 : i64} {
  func.func @_residual_network_kernel(%arg0: i32, %arg1: memref<512x32xf32, #tpu.memory_space<vmem>>, %arg2: memref<128x128xf32, #tpu.memory_space<vmem>>, %arg3: memref<2x32xf32, #tpu.memory_space<vmem>>, %arg4: memref<32x96xf32, #tpu.memory_space<vmem>>, %arg5: memref<1x96xf32, #tpu.memory_space<vmem>>, %arg6: memref<2x16x32xf32, #tpu.memory_space<vmem>>, %arg7: memref<1x32xf32, #tpu.memory_space<vmem>>, %arg8: memref<32x64xf32, #tpu.memory_space<vmem>>, %arg9: memref<1x64xf32, #tpu.memory_space<vmem>>, %arg10: memref<64x32xf32, #tpu.memory_space<vmem>>, %arg11: memref<1x32xf32, #tpu.memory_space<vmem>>, %arg12: memref<32x32xf32, #tpu.memory_space<vmem>>, %arg13: memref<1x32xf32, #tpu.memory_space<vmem>>, %arg14: memref<32x32xf32, #tpu.memory_space<vmem>>, %arg15: memref<1x32xf32, #tpu.memory_space<vmem>>, %arg16: memref<32x8xf32, #tpu.memory_space<vmem>>, %arg17: memref<1x8xf32, #tpu.memory_space<vmem>>, %arg18: memref<512x8xf32, #tpu.memory_space<vmem>>, %arg19: memref<128x32xf32, #tpu.memory_space<vmem>>) attributes {dimension_semantics = [#tpu.dimension_semantics<parallel>], iteration_bounds = array<i64: 4>, scalar_prefetch = 0 : i64, scratch_operands = 1 : i64, tpu.core_type = #tpu.core_type<tc>, window_params = [{transform_indices = @transform_0, window_bounds = array<i64: 512, 32>}, {pipeline_mode = #tpu.pipeline_mode<synchronous>, transform_indices = @transform_1, window_bounds = array<i64: 128, 128>}, {pipeline_mode = #tpu.pipeline_mode<synchronous>, transform_indices = @transform_2, window_bounds = array<i64: 2, 32>}, {pipeline_mode = #tpu.pipeline_mode<synchronous>, transform_indices = @transform_3, window_bounds = array<i64: 32, 96>}, {pipeline_mode = #tpu.pipeline_mode<synchronous>, transform_indices = @transform_4, window_bounds = array<i64: 1, 96>}, {pipeline_mode = #tpu.pipeline_mode<synchronous>, transform_indices = @transform_5, window_bounds = array<i64: 2, 16, 32>}, {pipeline_mode = #tpu.pipeline_mode<synchronous>, transform_indices = @transform_6, window_bounds = array<i64: 1, 32>}, {pipeline_mode = #tpu.pipeline_mode<synchronous>, transform_indices = @transform_7, window_bounds = array<i64: 32, 64>}, {pipeline_mode = #tpu.pipeline_mode<synchronous>, transform_indices = @transform_8, window_bounds = array<i64: 1, 64>}, {pipeline_mode = #tpu.pipeline_mode<synchronous>, transform_indices = @transform_9, window_bounds = array<i64: 64, 32>}, {pipeline_mode = #tpu.pipeline_mode<synchronous>, transform_indices = @transform_10, window_bounds = array<i64: 1, 32>}, {pipeline_mode = #tpu.pipeline_mode<synchronous>, transform_indices = @transform_11, window_bounds = array<i64: 32, 32>}, {pipeline_mode = #tpu.pipeline_mode<synchronous>, transform_indices = @transform_12, window_bounds = array<i64: 1, 32>}, {pipeline_mode = #tpu.pipeline_mode<synchronous>, transform_indices = @transform_13, window_bounds = array<i64: 32, 32>}, {pipeline_mode = #tpu.pipeline_mode<synchronous>, transform_indices = @transform_14, window_bounds = array<i64: 1, 32>}, {pipeline_mode = #tpu.pipeline_mode<synchronous>, transform_indices = @transform_15, window_bounds = array<i64: 32, 8>}, {pipeline_mode = #tpu.pipeline_mode<synchronous>, transform_indices = @transform_16, window_bounds = array<i64: 1, 8>}, {transform_indices = @transform_17, window_bounds = array<i64: 512, 8>}]} {
    %c0_i32 = arith.constant 0 : i32
    %c4_i32 = arith.constant 4 : i32
    %0 = arith.addi %c0_i32, %c4_i32 : i32
    %c1_i32 = arith.constant 1 : i32
    scf.for %arg20 = %c0_i32 to %0 step %c1_i32  : i32 {
      %c1_i32_1 = arith.constant 1 : i32
      %1 = arith.muli %arg20, %c1_i32_1 : i32
      %c0_i32_2 = arith.constant 0 : i32
      %2 = arith.addi %c0_i32_2, %1 : i32
      %c128_i32 = arith.constant 128 : i32
      %3 = arith.muli %2, %c128_i32 : i32
      %4 = tpu.assume_multiple %3, 128 : i32
      %c0 = arith.constant 0 : index
      %c0_3 = arith.constant 0 : index
      %5 = vector.load %arg3[%c0, %c0_3] : memref<2x32xf32, #tpu.memory_space<vmem>>, vector<2x32xf32>
      %6 = arith.index_cast %4 : i32 to index
      %c0_4 = arith.constant 0 : index
      %7 = vector.load %arg1[%6, %c0_4] : memref<512x32xf32, #tpu.memory_space<vmem>>, vector<128x32xf32>
      %8 = vector.extract_strided_slice %5 {offsets = [0, 0], sizes = [1, 32], strides = [1, 1]} : vector<2x32xf32> to vector<1x32xf32>
      %9 = vector.broadcast %8 : vector<1x32xf32> to vector<128x32xf32>
      %10 = arith.subf %7, %9 : vector<128x32xf32>
      %11 = vector.extract_strided_slice %5 {offsets = [1, 0], sizes = [1, 32], strides = [1, 1]} : vector<2x32xf32> to vector<1x32xf32>
      %12 = vector.broadcast %11 : vector<1x32xf32> to vector<128x32xf32>
      %13 = arith.mulf %10, %12 : vector<128x32xf32>
      %c0_5 = arith.constant 0 : index
      %c0_6 = arith.constant 0 : index
      %14 = vector.load %arg4[%c0_5, %c0_6] : memref<32x96xf32, #tpu.memory_space<vmem>>, vector<32x96xf32>
      %cst = arith.constant dense<0.000000e+00> : vector<128x96xf32>
      %15 = tpu.matmul %13, %14, %cst {dimension_numbers = #tpu.dot_dimension_numbers<[1], [0], [0], [1], [0, 0, 1, 1], [], []>} : vector<128x32xf32>, vector<32x96xf32>, vector<128x96xf32> -> vector<128x96xf32>
      %c0_7 = arith.constant 0 : index
      %c0_8 = arith.constant 0 : index
      %16 = vector.load %arg5[%c0_7, %c0_8] : memref<1x96xf32, #tpu.memory_space<vmem>>, vector<1x96xf32>
      %17 = vector.broadcast %16 : vector<1x96xf32> to vector<128x96xf32>
      %18 = arith.addf %15, %17 : vector<128x96xf32>
      %19 = vector.extract_strided_slice %18 {offsets = [0, 0], sizes = [128, 16], strides = [1, 1]} : vector<128x96xf32> to vector<128x16xf32>
      %20 = vector.extract_strided_slice %18 {offsets = [0, 32], sizes = [128, 16], strides = [1, 1]} : vector<128x96xf32> to vector<128x16xf32>
      %21 = vector.extract_strided_slice %18 {offsets = [0, 64], sizes = [128, 16], strides = [1, 1]} : vector<128x96xf32> to vector<128x16xf32>
      %cst_9 = arith.constant dense<0.000000e+00> : vector<128x128xf32>
      %22 = tpu.matmul %19, %20, %cst_9 {dimension_numbers = #tpu.dot_dimension_numbers<[1], [1], [0], [0], [0, 0, 1, 0], [], []>} : vector<128x16xf32>, vector<128x16xf32>, vector<128x128xf32> -> vector<128x128xf32>
      %c0_10 = arith.constant 0 : index
      %c0_11 = arith.constant 0 : index
      %23 = vector.load %arg2[%c0_10, %c0_11] : memref<128x128xf32, #tpu.memory_space<vmem>>, vector<128x128xf32>
      %24 = arith.addf %22, %23 : vector<128x128xf32>
      %cst_12 = arith.constant dense<0xFF800000> : vector<128xf32>
      %25 = vector.multi_reduction <maximumf>, %24, %cst_12 [1] : vector<128x128xf32> to vector<128xf32>
      %26 = vector.shape_cast %25 : vector<128xf32> to vector<128x1xf32>
      %27 = vector.broadcast %26 : vector<128x1xf32> to vector<128x128xf32>
      %28 = arith.subf %24, %27 : vector<128x128xf32>
      %29 = math.exp %28 : vector<128x128xf32>
      %cst_13 = arith.constant dense<0.000000e+00> : vector<128xf32>
      %30 = vector.multi_reduction <add>, %29, %cst_13 [1] : vector<128x128xf32> to vector<128xf32>
      %31 = vector.shape_cast %30 : vector<128xf32> to vector<128x1xf32>
      %32 = tpu.reciprocal %31 {approx = true} : vector<128x1xf32> -> vector<128x1xf32>
      %33 = vector.broadcast %32 : vector<128x1xf32> to vector<128x128xf32>
      %34 = arith.mulf %29, %33 : vector<128x128xf32>
      %cst_14 = arith.constant dense<0.000000e+00> : vector<128x16xf32>
      %35 = tpu.matmul %34, %21, %cst_14 {dimension_numbers = #tpu.dot_dimension_numbers<[1], [0], [0], [1], [0, 0, 1, 1], [], []>} : vector<128x128xf32>, vector<128x16xf32>, vector<128x16xf32> -> vector<128x16xf32>
      %c0_15 = arith.constant 0 : index
      %c0_16 = arith.constant 0 : index
      %c0_17 = arith.constant 0 : index
      %36 = vector.load %arg6[%c0_15, %c0_16, %c0_17] : memref<2x16x32xf32, #tpu.memory_space<vmem>>, vector<1x16x32xf32>
      %37 = vector.shape_cast %36 : vector<1x16x32xf32> to vector<16x32xf32>
      %cst_18 = arith.constant dense<0.000000e+00> : vector<128x32xf32>
      %38 = tpu.matmul %35, %37, %cst_18 {dimension_numbers = #tpu.dot_dimension_numbers<[1], [0], [0], [1], [0, 0, 1, 1], [], []>} : vector<128x16xf32>, vector<16x32xf32>, vector<128x32xf32> -> vector<128x32xf32>
      %c0_19 = arith.constant 0 : index
      %c0_20 = arith.constant 0 : index
      %39 = vector.load %arg19[%c0_19, %c0_20] : memref<128x32xf32, #tpu.memory_space<vmem>>, vector<128x32xf32>
      tpu.vector_store %arg19[%c0_19, %c0_20], %38 {strides = array<i32>} : memref<128x32xf32, #tpu.memory_space<vmem>>, vector<128x32xf32>,
      %40 = vector.extract_strided_slice %18 {offsets = [0, 16], sizes = [128, 16], strides = [1, 1]} : vector<128x96xf32> to vector<128x16xf32>
      %41 = vector.extract_strided_slice %18 {offsets = [0, 48], sizes = [128, 16], strides = [1, 1]} : vector<128x96xf32> to vector<128x16xf32>
      %42 = vector.extract_strided_slice %18 {offsets = [0, 80], sizes = [128, 16], strides = [1, 1]} : vector<128x96xf32> to vector<128x16xf32>
      %cst_21 = arith.constant dense<0.000000e+00> : vector<128x128xf32>
      %43 = tpu.matmul %40, %41, %cst_21 {dimension_numbers = #tpu.dot_dimension_numbers<[1], [1], [0], [0], [0, 0, 1, 0], [], []>} : vector<128x16xf32>, vector<128x16xf32>, vector<128x128xf32> -> vector<128x128xf32>
      %c0_22 = arith.constant 0 : index
      %c0_23 = arith.constant 0 : index
      %44 = vector.load %arg2[%c0_22, %c0_23] : memref<128x128xf32, #tpu.memory_space<vmem>>, vector<128x128xf32>
      %45 = arith.addf %43, %44 : vector<128x128xf32>
      %cst_24 = arith.constant dense<0xFF800000> : vector<128xf32>
      %46 = vector.multi_reduction <maximumf>, %45, %cst_24 [1] : vector<128x128xf32> to vector<128xf32>
      %47 = vector.shape_cast %46 : vector<128xf32> to vector<128x1xf32>
      %48 = vector.broadcast %47 : vector<128x1xf32> to vector<128x128xf32>
      %49 = arith.subf %45, %48 : vector<128x128xf32>
      %50 = math.exp %49 : vector<128x128xf32>
      %cst_25 = arith.constant dense<0.000000e+00> : vector<128xf32>
      %51 = vector.multi_reduction <add>, %50, %cst_25 [1] : vector<128x128xf32> to vector<128xf32>
      %52 = vector.shape_cast %51 : vector<128xf32> to vector<128x1xf32>
      %53 = tpu.reciprocal %52 {approx = true} : vector<128x1xf32> -> vector<128x1xf32>
      %54 = vector.broadcast %53 : vector<128x1xf32> to vector<128x128xf32>
      %55 = arith.mulf %50, %54 : vector<128x128xf32>
      %cst_26 = arith.constant dense<0.000000e+00> : vector<128x16xf32>
      %56 = tpu.matmul %55, %42, %cst_26 {dimension_numbers = #tpu.dot_dimension_numbers<[1], [0], [0], [1], [0, 0, 1, 1], [], []>} : vector<128x128xf32>, vector<128x16xf32>, vector<128x16xf32> -> vector<128x16xf32>
      %c1 = arith.constant 1 : index
      %c0_27 = arith.constant 0 : index
      %c0_28 = arith.constant 0 : index
      %57 = vector.load %arg6[%c1, %c0_27, %c0_28] : memref<2x16x32xf32, #tpu.memory_space<vmem>>, vector<1x16x32xf32>
      %58 = vector.shape_cast %57 : vector<1x16x32xf32> to vector<16x32xf32>
      %cst_29 = arith.constant dense<0.000000e+00> : vector<128x32xf32>
      %59 = tpu.matmul %56, %58, %cst_29 {dimension_numbers = #tpu.dot_dimension_numbers<[1], [0], [0], [1], [0, 0, 1, 1], [], []>} : vector<128x16xf32>, vector<16x32xf32>, vector<128x32xf32> -> vector<128x32xf32>
      %c0_30 = arith.constant 0 : index
      %c0_31 = arith.constant 0 : index
      %60 = vector.load %arg19[%c0_30, %c0_31] : memref<128x32xf32, #tpu.memory_space<vmem>>, vector<128x32xf32>
      %61 = arith.addf %60, %59 : vector<128x32xf32>
      %c0_32 = arith.constant 0 : index
      %c0_33 = arith.constant 0 : index
      %62 = vector.load %arg19[%c0_32, %c0_33] : memref<128x32xf32, #tpu.memory_space<vmem>>, vector<128x32xf32>
      tpu.vector_store %arg19[%c0_32, %c0_33], %61 {strides = array<i32>} : memref<128x32xf32, #tpu.memory_space<vmem>>, vector<128x32xf32>,
      %c0_34 = arith.constant 0 : index
      %c0_35 = arith.constant 0 : index
      %63 = vector.load %arg19[%c0_34, %c0_35] : memref<128x32xf32, #tpu.memory_space<vmem>>, vector<128x32xf32>
      %64 = arith.addf %13, %63 : vector<128x32xf32>
      %c0_36 = arith.constant 0 : index
      %c0_37 = arith.constant 0 : index
      %65 = vector.load %arg7[%c0_36, %c0_37] : memref<1x32xf32, #tpu.memory_space<vmem>>, vector<1x32xf32>
      %66 = vector.broadcast %65 : vector<1x32xf32> to vector<128x32xf32>
      %67 = arith.addf %64, %66 : vector<128x32xf32>
      %c0_38 = arith.constant 0 : index
      %c0_39 = arith.constant 0 : index
      %68 = vector.load %arg8[%c0_38, %c0_39] : memref<32x64xf32, #tpu.memory_space<vmem>>, vector<32x64xf32>
      %cst_40 = arith.constant dense<0.000000e+00> : vector<128x64xf32>
      %69 = tpu.matmul %67, %68, %cst_40 {dimension_numbers = #tpu.dot_dimension_numbers<[1], [0], [0], [1], [0, 0, 1, 1], [], []>} : vector<128x32xf32>, vector<32x64xf32>, vector<128x64xf32> -> vector<128x64xf32>
      %c0_41 = arith.constant 0 : index
      %c0_42 = arith.constant 0 : index
      %70 = vector.load %arg9[%c0_41, %c0_42] : memref<1x64xf32, #tpu.memory_space<vmem>>, vector<1x64xf32>
      %71 = vector.broadcast %70 : vector<1x64xf32> to vector<128x64xf32>
      %72 = arith.addf %69, %71 : vector<128x64xf32>
      %cst_43 = arith.constant 0.000000e+00 : f32
      %73 = vector.broadcast %cst_43 : f32 to vector<128x64xf32>
      %74 = arith.maximumf %72, %73 : vector<128x64xf32>
      %c0_44 = arith.constant 0 : index
      %c0_45 = arith.constant 0 : index
      %75 = vector.load %arg10[%c0_44, %c0_45] : memref<64x32xf32, #tpu.memory_space<vmem>>, vector<64x32xf32>
      %cst_46 = arith.constant dense<0.000000e+00> : vector<128x32xf32>
      %76 = tpu.matmul %74, %75, %cst_46 {dimension_numbers = #tpu.dot_dimension_numbers<[1], [0], [0], [1], [0, 0, 1, 1], [], []>} : vector<128x64xf32>, vector<64x32xf32>, vector<128x32xf32> -> vector<128x32xf32>
      %c0_47 = arith.constant 0 : index
      %c0_48 = arith.constant 0 : index
      %77 = vector.load %arg11[%c0_47, %c0_48] : memref<1x32xf32, #tpu.memory_space<vmem>>, vector<1x32xf32>
      %78 = vector.broadcast %77 : vector<1x32xf32> to vector<128x32xf32>
      %79 = arith.addf %76, %78 : vector<128x32xf32>
      %cst_49 = arith.constant 0.000000e+00 : f32
      %80 = vector.broadcast %cst_49 : f32 to vector<128x32xf32>
      %81 = arith.maximumf %79, %80 : vector<128x32xf32>
      %c0_50 = arith.constant 0 : index
      %c0_51 = arith.constant 0 : index
      %82 = vector.load %arg12[%c0_50, %c0_51] : memref<32x32xf32, #tpu.memory_space<vmem>>, vector<32x32xf32>
      %cst_52 = arith.constant dense<0.000000e+00> : vector<128x32xf32>
      %83 = tpu.matmul %81, %82, %cst_52 {dimension_numbers = #tpu.dot_dimension_numbers<[1], [0], [0], [1], [0, 0, 1, 1], [], []>} : vector<128x32xf32>, vector<32x32xf32>, vector<128x32xf32> -> vector<128x32xf32>
      %c0_53 = arith.constant 0 : index
      %c0_54 = arith.constant 0 : index
      %84 = vector.load %arg13[%c0_53, %c0_54] : memref<1x32xf32, #tpu.memory_space<vmem>>, vector<1x32xf32>
      %85 = vector.broadcast %84 : vector<1x32xf32> to vector<128x32xf32>
      %86 = arith.addf %83, %85 : vector<128x32xf32>
      %87 = arith.addf %86, %67 : vector<128x32xf32>
      %cst_55 = arith.constant 0.000000e+00 : f32
      %88 = vector.broadcast %cst_55 : f32 to vector<128x32xf32>
      %89 = arith.maximumf %87, %88 : vector<128x32xf32>
      %c0_56 = arith.constant 0 : index
      %c0_57 = arith.constant 0 : index
      %90 = vector.load %arg14[%c0_56, %c0_57] : memref<32x32xf32, #tpu.memory_space<vmem>>, vector<32x32xf32>
      %cst_58 = arith.constant dense<0.000000e+00> : vector<128x32xf32>
      %91 = tpu.matmul %89, %90, %cst_58 {dimension_numbers = #tpu.dot_dimension_numbers<[1], [0], [0], [1], [0, 0, 1, 1], [], []>} : vector<128x32xf32>, vector<32x32xf32>, vector<128x32xf32> -> vector<128x32xf32>
      %c0_59 = arith.constant 0 : index
      %c0_60 = arith.constant 0 : index
      %92 = vector.load %arg15[%c0_59, %c0_60] : memref<1x32xf32, #tpu.memory_space<vmem>>, vector<1x32xf32>
      %93 = vector.broadcast %92 : vector<1x32xf32> to vector<128x32xf32>
      %94 = arith.addf %91, %93 : vector<128x32xf32>
      %cst_61 = arith.constant 0.000000e+00 : f32
      %95 = vector.broadcast %cst_61 : f32 to vector<128x32xf32>
      %96 = arith.maximumf %94, %95 : vector<128x32xf32>
      %c0_62 = arith.constant 0 : index
      %c0_63 = arith.constant 0 : index
      %97 = vector.load %arg16[%c0_62, %c0_63] : memref<32x8xf32, #tpu.memory_space<vmem>>, vector<32x8xf32>
      %cst_64 = arith.constant dense<0.000000e+00> : vector<128x8xf32>
      %98 = tpu.matmul %96, %97, %cst_64 {dimension_numbers = #tpu.dot_dimension_numbers<[1], [0], [0], [1], [0, 0, 1, 1], [], []>} : vector<128x32xf32>, vector<32x8xf32>, vector<128x8xf32> -> vector<128x8xf32>
      %c0_65 = arith.constant 0 : index
      %c0_66 = arith.constant 0 : index
      %99 = vector.load %arg17[%c0_65, %c0_66] : memref<1x8xf32, #tpu.memory_space<vmem>>, vector<1x8xf32>
      %100 = vector.broadcast %99 : vector<1x8xf32> to vector<128x8xf32>
      %101 = arith.addf %98, %100 : vector<128x8xf32>
      %102 = arith.index_cast %4 : i32 to index
      %c0_67 = arith.constant 0 : index
      %103 = vector.load %arg18[%102, %c0_67] : memref<512x8xf32, #tpu.memory_space<vmem>>, vector<128x8xf32>
      tpu.vector_store %arg18[%102, %c0_67], %101 {strides = array<i32>} : memref<512x8xf32, #tpu.memory_space<vmem>>, vector<128x8xf32>,
    }
    %c4_i32_0 = arith.constant 4 : i32
    return
  }
  func.func @transform_0(%arg0: i32) -> (i32, i32) {
    %c0_i32 = arith.constant 0 : i32
    %c0_i32_0 = arith.constant 0 : i32
    return %arg0, %c0_i32 : i32, i32
  }
  func.func @transform_1(%arg0: i32) -> (i32, i32) {
    %c0_i32 = arith.constant 0 : i32
    %c0_i32_0 = arith.constant 0 : i32
    %c0_i32_1 = arith.constant 0 : i32
    return %c0_i32, %c0_i32_0 : i32, i32
  }
  func.func @transform_2(%arg0: i32) -> (i32, i32) {
    %c0_i32 = arith.constant 0 : i32
    %c0_i32_0 = arith.constant 0 : i32
    %c0_i32_1 = arith.constant 0 : i32
    return %c0_i32, %c0_i32_0 : i32, i32
  }
  func.func @transform_3(%arg0: i32) -> (i32, i32) {
    %c0_i32 = arith.constant 0 : i32
    %c0_i32_0 = arith.constant 0 : i32
    %c0_i32_1 = arith.constant 0 : i32
    return %c0_i32, %c0_i32_0 : i32, i32
  }
  func.func @transform_4(%arg0: i32) -> (i32, i32) {
    %c0_i32 = arith.constant 0 : i32
    %c0_i32_0 = arith.constant 0 : i32
    %c0_i32_1 = arith.constant 0 : i32
    return %c0_i32, %c0_i32_0 : i32, i32
  }
  func.func @transform_5(%arg0: i32) -> (i32, i32, i32) {
    %c0_i32 = arith.constant 0 : i32
    %c0_i32_0 = arith.constant 0 : i32
    %c0_i32_1 = arith.constant 0 : i32
    %c0_i32_2 = arith.constant 0 : i32
    return %c0_i32, %c0_i32_0, %c0_i32_1 : i32, i32, i32
  }
  func.func @transform_6(%arg0: i32) -> (i32, i32) {
    %c0_i32 = arith.constant 0 : i32
    %c0_i32_0 = arith.constant 0 : i32
    %c0_i32_1 = arith.constant 0 : i32
    return %c0_i32, %c0_i32_0 : i32, i32
  }
  func.func @transform_7(%arg0: i32) -> (i32, i32) {
    %c0_i32 = arith.constant 0 : i32
    %c0_i32_0 = arith.constant 0 : i32
    %c0_i32_1 = arith.constant 0 : i32
    return %c0_i32, %c0_i32_0 : i32, i32
  }
  func.func @transform_8(%arg0: i32) -> (i32, i32) {
    %c0_i32 = arith.constant 0 : i32
    %c0_i32_0 = arith.constant 0 : i32
    %c0_i32_1 = arith.constant 0 : i32
    return %c0_i32, %c0_i32_0 : i32, i32
  }
  func.func @transform_9(%arg0: i32) -> (i32, i32) {
    %c0_i32 = arith.constant 0 : i32
    %c0_i32_0 = arith.constant 0 : i32
    %c0_i32_1 = arith.constant 0 : i32
    return %c0_i32, %c0_i32_0 : i32, i32
  }
  func.func @transform_10(%arg0: i32) -> (i32, i32) {
    %c0_i32 = arith.constant 0 : i32
    %c0_i32_0 = arith.constant 0 : i32
    %c0_i32_1 = arith.constant 0 : i32
    return %c0_i32, %c0_i32_0 : i32, i32
  }
  func.func @transform_11(%arg0: i32) -> (i32, i32) {
    %c0_i32 = arith.constant 0 : i32
    %c0_i32_0 = arith.constant 0 : i32
    %c0_i32_1 = arith.constant 0 : i32
    return %c0_i32, %c0_i32_0 : i32, i32
  }
  func.func @transform_12(%arg0: i32) -> (i32, i32) {
    %c0_i32 = arith.constant 0 : i32
    %c0_i32_0 = arith.constant 0 : i32
    %c0_i32_1 = arith.constant 0 : i32
    return %c0_i32, %c0_i32_0 : i32, i32
  }
  func.func @transform_13(%arg0: i32) -> (i32, i32) {
    %c0_i32 = arith.constant 0 : i32
    %c0_i32_0 = arith.constant 0 : i32
    %c0_i32_1 = arith.constant 0 : i32
    return %c0_i32, %c0_i32_0 : i32, i32
  }
  func.func @transform_14(%arg0: i32) -> (i32, i32) {
    %c0_i32 = arith.constant 0 : i32
    %c0_i32_0 = arith.constant 0 : i32
    %c0_i32_1 = arith.constant 0 : i32
    return %c0_i32, %c0_i32_0 : i32, i32
  }
  func.func @transform_15(%arg0: i32) -> (i32, i32) {
    %c0_i32 = arith.constant 0 : i32
    %c0_i32_0 = arith.constant 0 : i32
    %c0_i32_1 = arith.constant 0 : i32
    return %c0_i32, %c0_i32_0 : i32, i32
  }
  func.func @transform_16(%arg0: i32) -> (i32, i32) {
    %c0_i32 = arith.constant 0 : i32
    %c0_i32_0 = arith.constant 0 : i32
    %c0_i32_1 = arith.constant 0 : i32
    return %c0_i32, %c0_i32_0 : i32, i32
  }
  func.func @transform_17(%arg0: i32) -> (i32, i32) {
    %c0_i32 = arith.constant 0 : i32
    %c0_i32_0 = arith.constant 0 : i32
    return %arg0, %c0_i32 : i32, i32
  }
}

</mosaic_0001>

<bundles_post_ra>
// kernel: tpu_custom_call.1
= control target key start
LH: loop header
LB: loop body
LE: loop exit
PB: predicated region body
PF: predicated region fallthrough
CT: control target
= control target key end

     0   :  { %s3331_s24 = smov 0   ;;  %s4585_s0 = inlined_call_operand.vmem [shape: f32[2048,32], index: 0, kind: input, shape index: {}]   ;;  %s4586_s1 = inlined_call_operand.vmem [shape: f32[128,128], index: 1, kind: input, shape index: {}]   ;;  %s4587_s2 = inlined_call_operand.vmem [shape: f32[2,32], index: 2, kind: input, shape index: {}]   ;;  %s4588_s3 = inlined_call_operand.vmem [shape: f32[32,96], index: 3, kind: input, shape index: {}]   ;;  %s4589_s4 = inlined_call_operand.vmem [shape: f32[1,96], index: 4, kind: input, shape index: {}]   ;;  %s4590_s5 = inlined_call_operand.vmem [shape: f32[2,16,32], index: 5, kind: input, shape index: {}]   ;;  %s4591_s6 = inlined_call_operand.vmem [shape: f32[1,32], index: 6, kind: input, shape index: {}]   ;;  %s4592_s7 = inlined_call_operand.vmem [shape: f32[32,64], index: 7, kind: input, shape index: {}]   ;;  %s4593_s8 = inlined_call_operand.vmem [shape: f32[1,64], index: 8, kind: input, shape index: {}]   ;;  %s4594_s9 = inlined_call_operand.vmem [shape: f32[64,32], index: 9, kind: input, shape index: {}]   ;;  %s4595_s10 = inlined_call_operand.vmem [shape: f32[1,32], index: 10, kind: input, shape index: {}]   ;;  %s4596_s11 = inlined_call_operand.vmem [shape: f32[32,32], index: 11, kind: input, shape index: {}]   ;;  %s4597_s12 = inlined_call_operand.vmem [shape: f32[1,32], index: 12, kind: input, shape index: {}]   ;;  %s4598_s13 = inlined_call_operand.vmem [shape: f32[32,32], index: 13, kind: input, shape index: {}]   ;;  %s4599_s14 = inlined_call_operand.vmem [shape: f32[1,32], index: 14, kind: input, shape index: {}]   ;;  %s4600_s15 = inlined_call_operand.vmem [shape: f32[32,8], index: 15, kind: input, shape index: {}]   ;;  %s4601_s16 = inlined_call_operand.vmem [shape: f32[1,8], index: 16, kind: input, shape index: {}]   ;;  %s4602_s17 = inlined_call_operand.vmem [shape: f32[2048,8], index: 17, kind: output, shape index: {}]  }
   0x1   :  { %4625 = sst [smem:[#allocation23_spill]] %s4585_s0 }
   0x2   :  { %4626 = sst [smem:[#allocation24_spill]] %s4586_s1 }
   0x3 LB: > { %s2770_s25 = sadd.s32 4294967295, %s3230_s24   ;;  %p2774_p0 = scmp.ge.s32.totalorder %s3230_s24, 1  ;;  %s3230_s24 = sphi %s3331_s24, %s27_s24  }
   0x4   : > { %p488_p1 = scmp.lt.s32.totalorder %s3230_s24, 5 }
   0x6   : > { %p489_p2 = pnand %p2774_p0, %p488_p1 }
   0x7   : > { %s2775_s26 = sshll.u32 (!%p489_p2), %s2770_s25, 6  ;;  %s4627_s0 = sld [smem:[#allocation23_spill]] (!%p489_p2) }
   0x8   : > { %492 = sbr.rel (%p489_p2) target bundleno = 2751 (0xabf), region = 88  ;;  %p541_p3 = scmp.lt.s32.totalorder (!%p489_p2), %s2775_s26, 255 }
   0x9   : > { %s3349_s20 = smov (!%p489_p2), 0  }
   0xd   : > { %s4671_s26 = smov (!%p541_p3, %s2775_s26), 255 }
   0xe   : > { %s2776_s27 = sshll.u32 %s4671_s26, 3 }
   0xf   : > { %s3342_s30 = scalar_lea.vmem %s4627_s0, %s2776_s27  ;;  %s3347_s1 = scalar_lea.vmem %s4602_s17, %s2776_s27 }
  0x10 LB: >> { %v614_v0 = vld [vmem:[%s4588_s3 + $0x18] sm:$0xff]  ;;  %v613_v1 = vld [vmem:[%s4588_s3 + $0x10] sm:$0xff]  ;;  %v559_v2 = vld [vmem:[%s4587_s2] sm:$0x3]  ;;  %s4624_s0 = sshll.u32 %s3234_s20, 7  ;;  %vm619_vm0 = vcmask 261120   ;;  %s3234_s20 = sphi %s3349_s20, %s557_s20  }
  0x11   : >> { %680 = vmatpush.msra.mxu0 %v614_v0  ;;  %v612_v3 = vld [vmem:[%s4588_s3 + $0x8] sm:$0xff]  ;;  %v3367_v4 = vperm.slane %v559_v2, 0  ;;  %v3369_v5 = vperm.slane %v559_v2, 1  ;;  %s3374_s18 = scalar_lea.vmem %s3342_s30, %s4624_s0  ;;  %v611_v6 = vld [vmem:[%s4588_s3] sm:$0xff]  ;;  %s3236_s25 = smov 96   ;;  %vm797_vm1 = vcmask 130048  }
  0x12   : >> { %v561_v7 = vld [vmem:[%s3374_s18] sm:$0xff]  ;;  %v562_v9 = vld [vmem:[%s3374_s18 + $0x8] sm:$0xff]  ;;  %v563_v13 = vld [vmem:[%s3374_s18 + $0x10] sm:$0xff]  ;;  %s3237_s26 = smov 64   ;;  %s4644_s29 = sld [smem:[#allocation24_spill]]  ;;  %vm2146_vm2 = vcmask 523264  }
  0x13   : >> { %681 = vmatpush.msra.mxu0 %v613_v1  ;;  %v578_v8 = vsub.f32 %v561_v7, %v3367_v4  ;;  %v579_v11 = vsub.f32 %v562_v9, %v3367_v4  ;;  %v580_v14 = vsub.f32 %v563_v13, %v3367_v4  ;;  %v564_v16 = vld [vmem:[%s3374_s18 + $0x18] sm:$0xff]  ;;  %v565_v19 = vld [vmem:[%s3374_s18 + $0x20] sm:$0xff]  ;;  %v566_v22 = vld [vmem:[%s3374_s18 + $0x28] sm:$0xff]  ;;  %s3238_s23 = smov 80   ;;  %s3240_s19 = smov 48   ;;  %vm2688_vm3 = vcmask 64512  }
  0x14   : >> { %v581_v17 = vsub.f32 %v564_v16, %v3367_v4  ;;  %v582_v20 = vsub.f32 %v565_v19, %v3367_v4  ;;  %v583_v23 = vsub.f32 %v566_v22, %v3367_v4  ;;  %v567_v25 = vld [vmem:[%s3374_s18 + $0x30] sm:$0xff]  ;;  %v568_v28 = vld [vmem:[%s3374_s18 + $0x38] sm:$0xff]  ;;  %v569_v31 = vld [vmem:[%s3374_s18 + $0x40] sm:$0xff]  ;;  %s4669_s28 = sshll.u32 %s3234_s20, 7  ;;  %s557_s20 = sadd.s32 1, %s3234_s20  }
  0x15   : >> { %682 = vmatpush.msra.mxu0 %v612_v3  ;;  %v3383_v10 = vmul.f32 %v3369_v5, %v578_v8  ;;  %v3389_v12 = vmul.f32 %v3369_v5, %v579_v11  ;;  %v3396_v15 = vmul.f32 %v3369_v5, %v580_v14  ;;  %v584_v26 = vsub.f32 %v567_v25, %v3367_v4  ;;  %v570_v34 = vld [vmem:[%s3374_s18 + $0x48] sm:$0xff]  ;;  %v571_v37 = vld [vmem:[%s3374_s18 + $0x50] sm:$0xff]  ;;  %v572_v40 = vld [vmem:[%s3374_s18 + $0x58] sm:$0xff]  ;;  %p554_p4 = scmp.ge.s32.totalorder %s557_s20, 4  }
  0x16   : >> { %v3403_v18 = vmul.f32 %v3369_v5, %v581_v17  ;;  %v3410_v21 = vmul.f32 %v3369_v5, %v582_v20  ;;  %v3417_v24 = vmul.f32 %v3369_v5, %v583_v23  ;;  %v585_v29 = vsub.f32 %v568_v28, %v3367_v4  ;;  %v573_v43 = vld [vmem:[%s3374_s18 + $0x60] sm:$0xff]  ;;  %v574_v46 = vld [vmem:[%s3374_s18 + $0x68] sm:$0xff]  ;;  %v575_v49 = vld [vmem:[%s3374_s18 + $0x70] sm:$0xff] }
  0x17   : >> { %683 = vmatpush.msra.mxu0 %v611_v6  ;;  %4628 = vst [vmem:[#allocation3_spill] sm:$0xff] %v3383_v10  ;;  %v3424_v27 = vmul.f32 %v3369_v5, %v584_v26  ;;  %v586_v32 = vsub.f32 %v569_v31, %v3367_v4  ;;  %v587_v35 = vsub.f32 %v570_v34, %v3367_v4  ;;  %v576_v52 = vld [vmem:[%s3374_s18 + $0x78] sm:$0xff]  ;;  %v3085_v2 = vld [vmem:[%s4589_s4] ss:$0 sm:$0xff]  ;;  %s3239_s18 = smov 112  }
  0x18   : >> { %2780 = vmatmul.msk.f32.vlgmr.msra.gmra.mxu0 %vm619_vm0, %v3383_v10  ;;  %4629 = vst [vmem:[#allocation4_spill] sm:$0xff] %v3389_v12  ;;  %v3431_v30 = vmul.f32 %v3369_v5, %v585_v29  ;;  %v588_v38 = vsub.f32 %v571_v37, %v3367_v4  ;;  %v589_v41 = vsub.f32 %v572_v40, %v3367_v4 }
  0x19   : >> { %4630 = vst [vmem:[#allocation5_spill] sm:$0xff] %v3396_v15  ;;  %v3438_v33 = vmul.f32 %v3369_v5, %v586_v32  ;;  %v3445_v36 = vmul.f32 %v3369_v5, %v587_v35  ;;  %v590_v44 = vsub.f32 %v573_v43, %v3367_v4  ;;  %v591_v47 = vsub.f32 %v574_v46, %v3367_v4 }
  0x1a   : >> { %4631 = vst [vmem:[#allocation6_spill] sm:$0xff] %v3403_v18  ;;  %v3452_v39 = vmul.f32 %v3369_v5, %v588_v38  ;;  %v3459_v42 = vmul.f32 %v3369_v5, %v589_v41  ;;  %v592_v50 = vsub.f32 %v575_v49, %v3367_v4  ;;  %v593_v53 = vsub.f32 %v576_v52, %v3367_v4 }
  0x1b   : >> { %4632 = vst [vmem:[#allocation7_spill] sm:$0xff] %v3410_v21  ;;  %v3466_v45 = vmul.f32 %v3369_v5, %v590_v44  ;;  %v3473_v48 = vmul.f32 %v3369_v5, %v591_v47 }
  0x1c   : >> { %4633 = vst [vmem:[#allocation8_spill] sm:$0xff] %v3417_v24  ;;  %v3480_v51 = vmul.f32 %v3369_v5, %v592_v50  ;;  %v3487_v54 = vmul.f32 %v3369_v5, %v593_v53 }
  0x1d   : >> { %4634 = vst [vmem:[#allocation9_spill] sm:$0xff] %v3424_v27 }
  0x1e   : >> { %4635 = vst [vmem:[#allocation10_spill] sm:$0xff] %v3431_v30 }
  0x1f   : >> { %4636 = vst [vmem:[#allocation11_spill] sm:$0xff] %v3438_v33 }
  0x20   : >> { %2781 = vmatmul.msk.f32.gmra.mxu0 %vm619_vm0, %v3389_v12  ;;  %4637 = vst [vmem:[#allocation12_spill] sm:$0xff] %v3445_v36 }
  0x21   : >> { %4638 = vst [vmem:[#allocation13_spill] sm:$0xff] %v3452_v39 }
  0x22   : >> { %4639 = vst [vmem:[#allocation14_spill] sm:$0xff] %v3459_v42 }
  0x23   : >> { %4640 = vst [vmem:[#allocation15_spill] sm:$0xff] %v3466_v45 }
  0x24   : >> { %4641 = vst [vmem:[#allocation16_spill] sm:$0xff] %v3473_v48 }
  0x25   : >> { %4642 = vst [vmem:[#allocation17_spill] sm:$0xff] %v3480_v51 }
  0x26   : >> { %4643 = vst [vmem:[#allocation18_spill] sm:$0xff] %v3487_v54 }
  0x28   : >> { %2782 = vmatmul.msk.f32.gmra.mxu0 %vm619_vm0, %v3396_v15  ;;  %v3799_v15 = vld [vmem:[%s4644_s29 + $0x78] sm:$0xff] }
  0x29   : >> { %4647 = vst [vmem:[#allocation21_spill] sm:$0xff] %v3799_v15 }
  0x30   : >> { %2783 = vmatmul.msk.f32.gmra.mxu0 %vm619_vm0, %v3403_v18 }
  0x38   : >> { %2784 = vmatmul.msk.f32.gmra.mxu0 %vm619_vm0, %v3410_v21 }
  0x40   : >> { %2785 = vmatmul.msk.f32.gmra.mxu0 %vm619_vm0, %v3417_v24 }
  0x48   : >> { %2786 = vmatmul.msk.f32.gmra.mxu0 %vm619_vm0, %v3424_v27 }
  0x50   : >> { %2787 = vmatmul.msk.f32.gmra.mxu0 %vm619_vm0, %v3431_v30 }
  0x58   : >> { %2788 = vmatmul.msk.f32.gmra.mxu0 %vm619_vm0, %v3438_v33 }
  0x60   : >> { %2789 = vmatmul.msk.f32.gmra.mxu0 %vm619_vm0, %v3445_v36 }
  0x68   : >> { %2790 = vmatmul.msk.f32.gmra.mxu0 %vm619_vm0, %v3452_v39 }
  0x70   : >> { %2791 = vmatmul.msk.f32.gmra.mxu0 %vm619_vm0, %v3459_v42 }
  0x78   : >> { %2792 = vmatmul.msk.f32.gmra.mxu0 %vm619_vm0, %v3466_v45  ;;  %v3720_v45 = vld [vmem:[%s4644_s29 + $0x40] sm:$0xff] }
  0x80   : >> { %2793 = vmatmul.msk.f32.gmra.mxu0 %vm619_vm0, %v3473_v48 }
  0x88   : >> { %2794 = vmatmul.msk.f32.gmra.mxu0 %vm619_vm0, %v3480_v51 }
  0x90   : >> { %2795 = vmatmul.msk.f32.gmra.mxu0 %vm619_vm0, %v3487_v54 }
  0x95   : >> { %v685_v55 = vpop.f32.mrf.mxu0 }
  0x96   : >> { %v3566_v34 = vadd.f32 %v3085_v2, %v685_v55 }
  0x9d   : >> { %v688_v56 = vpop.f32.mrf.mxu0 }
  0x9e   : >> { %v3522_v20 = vadd.f32 %v3085_v2, %v688_v56 }
  0xa5   : >> { %v691_v57 = vpop.f32.mrf.mxu0 }
  0xa6   : >> { %v3544_v26 = vadd.f32 %v3085_v2, %v691_v57 }
  0xad   : >> { %v694_v58 = vpop.f32.mrf.mxu0 }
  0xae   : >> { %v3562_v32 = vadd.f32 %v3085_v2, %v694_v58 }
  0xb5   : >> { %v697_v59 = vpop.f32.mrf.mxu0 }
  0xb6   : >> { %v3510_v13 = vadd.f32 %v3085_v2, %v697_v59 }
  0xbd   : >> { %v700_v60 = vpop.f32.mrf.mxu0 }
  0xbe   : >> { %v3530_v22 = vadd.f32 %v3085_v2, %v700_v60 }
  0xc5   : >> { %v703_v61 = vpop.f32.mrf.mxu0 }
  0xc6   : >> { %v3552_v29 = vadd.f32 %v3085_v2, %v703_v61 }
  0xcd   : >> { %v706_v62 = vpop.f32.mrf.mxu0 }
  0xce   : >> { %v3502_v8 = vadd.f32 %v3085_v2, %v706_v62 }
  0xd0   : >> { %v3584_v38 = vpack.i.bf16 %v3552_v29, %v3502_v8 }
  0xd5   : >> { %v709_v63 = vpop.f32.mrf.mxu0 }
  0xd6   : >> { %v3518_v17 = vadd.f32 %v3085_v2, %v709_v63 }
  0xdd   : >> { %v712_v0 = vpop.f32.mrf.mxu0 }
  0xde   : >> { %v3546_v28 = vadd.f32 %v3085_v2, %v712_v0 }
  0xe0   : >> { %v3578_v37 = vpack.i.bf16 %v3518_v17, %v3546_v28 }
  0xe5   : >> { %v715_v1 = vpop.f32.mrf.mxu0 }
  0xe6   : >> { %v3498_v6 = vadd.f32 %v3085_v2, %v715_v1 }
  0xed   : >> { %v718_v3 = vpop.f32.mrf.mxu0 }
  0xee   : >> { %v3494_v4 = vadd.f32 %v3085_v2, %v718_v3 }
  0xf0   : >> { %787 = vrot.lane.b32.xlu2 %v3494_v4, %s3236_s25  ;;  %v3536_v25 = vpack.i.bf16 %v3498_v6, %v3494_v4 }
  0xf5   : >> { %v721_v5 = vpop.f32.mrf.mxu0 }
  0xf6   : >> { %v3512_v14 = vadd.f32 %v3085_v2, %v721_v5 }
  0xf8   : >> { %785 = vrot.lane.b32.xlu2 %v3498_v6, %s3236_s25 }
  0xfd   : >> { %v724_v7 = vpop.f32.mrf.mxu0 }
  0xfe   : >> { %v3504_v9 = vadd.f32 %v3085_v2, %v724_v7 }
 0x100   : >> { %791 = vrot.lane.b32.xlu1 %v3504_v9, %s3236_s25  ;;  %779 = vrot.lane.b32.xlu2 %v3502_v8, %s3236_s25  ;;  %v3572_v35 = vpack.i.bf16 %v3512_v14, %v3504_v9 }
 0x105   : >> { %v727_v11 = vpop.f32.mrf.mxu0 }
 0x106   : >> { %v3532_v23 = vadd.f32 %v3085_v2, %v727_v11 }
 0x108   : >> { %789 = vrot.lane.b32.xlu1 %v3512_v14, %s3236_s25  ;;  %773 = vrot.lane.b32.xlu2 %v3510_v13, %s3236_s25 }
 0x10d   : >> { %v730_v16 = vpop.f32.mrf.mxu0 }
 0x10e   : >> { %v3520_v19 = vadd.f32 %v3085_v2, %v730_v16 }
 0x110   : >> { %795 = vrot.lane.b32.xlu0 %v3520_v19, %s3236_s25  ;;  %781 = vrot.lane.b32.xlu1 %v3518_v17, %s3236_s25  ;;  %v3556_v31 = vpack.i.bf16 %v3532_v23, %v3520_v19 }
 0x111   : >> { %767 = vrot.lane.b32.xlu2 %v3522_v20, %s3236_s25 }
 0x118   : >> { %793 = vrot.lane.b32.xlu0 %v3532_v23, %s3236_s25  ;;  %775 = vrot.lane.b32.xlu1 %v3530_v22, %s3236_s25 }
 0x119   : >> { %3011 = vrot.lane.b32.xlu2 %v3536_v25, %s3237_s26 }
 0x120   : >> { %783 = vrot.lane.b32.xlu0 %v3546_v28, %s3236_s25  ;;  %769 = vrot.lane.b32.xlu1 %v3544_v26, %s3236_s25 }
 0x128   : >> { %777 = vrot.lane.b32.xlu0 %v3552_v29, %s3236_s25  ;;  %3026 = vrot.lane.b32.xlu1 %v3556_v31, %s3237_s26 }
 0x130   : >> { %771 = vrot.lane.b32.xlu0 %v3562_v32, %s3236_s25 }
 0x138   : >> { %765 = vrot.lane.b32.xlu0 %v3566_v34, %s3236_s25 }
 0x140   : >> { %3006 = vrot.lane.b32.xlu0 %v3572_v35, %s3237_s26 }
 0x148   : >> { %3016 = vrot.lane.b32.xlu0 %v3578_v37, %s3237_s26 }
 0x14a   : >> { %v788_v43 = vpop.permute.xlu2 %787 }
 0x150   : >> { %3021 = vrot.lane.b32.xlu0 %v3584_v38, %s3237_s26 }
 0x152   : >> { %v786_v50 = vpop.permute.xlu2 %785 }
 0x15a   : >> { %v780_v55 = vpop.permute.xlu2 %779 }
 0x162   : >> { %v774_v60 = vpop.permute.xlu2 %773 }
 0x16b   : >> { %v768_v62 = vpop.permute.xlu2 %767 }
 0x172   : >> { %v792_v40 = vpop.permute.xlu1 %791 }
 0x173   : >> { %v3012_v2 = vpop.permute.xlu2 %3011 }
 0x174   : >> { %v3013_v5 = vunpack.i.l.bf16 %v3012_v2  ;;  %v3014_v7 = vunpack.i.h.bf16 %v3012_v2 }
 0x17a   : >> { %v790_v41 = vpop.permute.xlu1 %789 }
 0x182   : >> { %v796_v44 = vpop.permute.xlu0 %795  ;;  %v782_v46 = vpop.permute.xlu1 %781 }
 0x183   : >> { %2796 = vmatpush.xpose.msk.msra.mxu1 %vm797_vm1, %v796_v44 }
 0x18a   : >> { %v794_v47 = vpop.permute.xlu0 %793  ;;  %v776_v49 = vpop.permute.xlu1 %775 }
 0x18b   : >> { %2797 = vmatpush.xpose.msk.msra.mxu1 %vm797_vm1, %v794_v47 }
 0x18f   : >> { %2798 = vmatpush.xpose.msk.msra.mxu1 %vm797_vm1, %v792_v40 }
 0x192   : >> { %v784_v52 = vpop.permute.xlu0 %783  ;;  %v770_v53 = vpop.permute.xlu1 %769 }
 0x193   : >> { %2799 = vmatpush.xpose.msk.msra.mxu1 %vm797_vm1, %v790_v41 }
 0x197   : >> { %2800 = vmatpush.xpose.msk.msra.mxu1 %vm797_vm1, %v788_v43 }
 0x19a   : >> { %v778_v56 = vpop.permute.xlu0 %777  ;;  %v3027_v57 = vpop.permute.xlu1 %3026 }
 0x19b   : >> { %2801 = vmatpush.xpose.msk.msra.mxu1 %vm797_vm1, %v786_v50  ;;  %v3028_v58 = vunpack.i.l.bf16 %v3027_v57  ;;  %v3029_v59 = vunpack.i.h.bf16 %v3027_v57  ;;  %v3645_v50 = vld [vmem:[%s4644_s29 + $0x8] sm:$0xff] }
 0x19d   : >> { %1119 = vmatpush.msra.mxu2 %v3028_v58  ;;  %v3657_v58 = vld [vmem:[%s4644_s29 + $0x18] sm:$0xff] }
 0x19f   : >> { %2802 = vmatpush.xpose.msk.msra.mxu1 %vm797_vm1, %v784_v52  ;;  %1120 = vmatpush.msra.mxu2 %v3029_v59 }
 0x1a2   : >> { %v772_v61 = vpop.permute.xlu0 %771 }
 0x1a3   : >> { %2803 = vmatpush.xpose.msk.msra.mxu1 %vm797_vm1, %v782_v46  ;;  %v3639_v46 = vld [vmem:[%s4644_s29] sm:$0xff] }
 0x1a7   : >> { %2804 = vmatpush.xpose.msk.msra.mxu1 %vm797_vm1, %v780_v55  ;;  %v3651_v55 = vld [vmem:[%s4644_s29 + $0x10] sm:$0xff] }
 0x1aa   : >> { %v766_v63 = vpop.permute.xlu0 %765 }
 0x1ab   : >> { %2805 = vmatpush.xpose.msk.msra.mxu1 %vm797_vm1, %v778_v56 }
 0x1af   : >> { %2806 = vmatpush.xpose.msk.msra.mxu1 %vm797_vm1, %v776_v49 }
 0x1b2   : >> { %v3007_v0 = vpop.permute.xlu0 %3006 }
 0x1b3   : >> { %2807 = vmatpush.xpose.msk.msra.mxu1 %vm797_vm1, %v774_v60  ;;  %v3008_v1 = vunpack.i.l.bf16 %v3007_v0  ;;  %v3009_v3 = vunpack.i.h.bf16 %v3007_v0  ;;  %v3671_v0 = vpack.i.bf16 %v3510_v13, %v3530_v22 }
 0x1b5   : >> { %1121 = vmatpush.msra.mxu2 %v3008_v1  ;;  %v3676_v1 = vld [vmem:[%s4644_s29 + $0x28] sm:$0xff] }
 0x1b7   : >> { %2808 = vmatpush.xpose.msk.msra.mxu1 %vm797_vm1, %v772_v61  ;;  %1122 = vmatpush.msra.mxu2 %v3009_v3  ;;  %v3663_v61 = vld [vmem:[%s4644_s29 + $0x20] sm:$0xff] }
 0x1b9   : >> { %1123 = vmatpush.msra.mxu2 %v3013_v5  ;;  %v3687_v5 = vld [vmem:[%s4644_s29 + $0x30] sm:$0xff] }
 0x1ba   : >> { %v3017_v11 = vpop.permute.xlu0 %3016 }
 0x1bb   : >> { %2809 = vmatpush.xpose.msk.msra.mxu1 %vm797_vm1, %v770_v53  ;;  %1124 = vmatpush.msra.mxu2 %v3014_v7  ;;  %v3018_v16 = vunpack.i.l.bf16 %v3017_v11  ;;  %v3019_v40 = vunpack.i.h.bf16 %v3017_v11 }
 0x1bd   : >> { %1125 = vmatpush.msra.mxu2 %v3018_v16  ;;  %v3696_v16 = vld [vmem:[%s4644_s29 + $0x38] sm:$0xff] }
 0x1bf   : >> { %2810 = vmatpush.xpose.msk.msra.mxu1 %vm797_vm1, %v768_v62  ;;  %1126 = vmatpush.msra.mxu2 %v3019_v40 }
 0x1c2   : >> { %v3022_v41 = vpop.permute.xlu0 %3021 }
 0x1c3   : >> { %2811 = vmatpush.xpose.msk.msra.mxu1 %vm797_vm1, %v766_v63  ;;  %v3023_v43 = vunpack.i.l.bf16 %v3022_v41  ;;  %v3024_v44 = vunpack.i.h.bf16 %v3022_v41 }
 0x1c5   : >> { %1127 = vmatpush.msra.mxu2 %v3023_v43  ;;  %v3704_v43 = vpack.i.bf16 %v3544_v26, %v3562_v32 }
 0x1c6   : >> { %2812 = vmatmul.msk.f32.vlgmr.msra.gmra.mxu1 %vm797_vm1, %v3566_v34 }
 0x1c7   : >> { %1128 = vmatpush.msra.mxu2 %v3024_v44  ;;  %v3710_v44 = vpack.i.bf16 %v3566_v34, %v3522_v20 }
 0x1ce   : >> { %2813 = vmatmul.msk.f32.gmra.mxu1 %vm797_vm1, %v3522_v20 }
 0x1d6   : >> { %2814 = vmatmul.msk.f32.gmra.mxu1 %vm797_vm1, %v3544_v26 }
 0x1de   : >> { %2815 = vmatmul.msk.f32.gmra.mxu1 %vm797_vm1, %v3562_v32 }
 0x1e6   : >> { %2816 = vmatmul.msk.f32.gmra.mxu1 %vm797_vm1, %v3510_v13 }
 0x1ee   : >> { %2817 = vmatmul.msk.f32.gmra.mxu1 %vm797_vm1, %v3530_v22 }
 0x1f6   : >> { %2818 = vmatmul.msk.f32.gmra.mxu1 %vm797_vm1, %v3552_v29 }
 0x1fe   : >> { %2819 = vmatmul.msk.f32.gmra.mxu1 %vm797_vm1, %v3502_v8 }
 0x206   : >> { %2820 = vmatmul.msk.f32.gmra.mxu1 %vm797_vm1, %v3518_v17 }
 0x20e   : >> { %2821 = vmatmul.msk.f32.gmra.mxu1 %vm797_vm1, %v3546_v28 }
 0x216   : >> { %2822 = vmatmul.msk.f32.gmra.mxu1 %vm797_vm1, %v3498_v6 }
 0x21e   : >> { %2823 = vmatmul.msk.f32.gmra.mxu1 %vm797_vm1, %v3494_v4 }
 0x226   : >> { %2824 = vmatmul.msk.f32.gmra.mxu1 %vm797_vm1, %v3512_v14 }
 0x22e   : >> { %2825 = vmatmul.msk.f32.gmra.mxu1 %vm797_vm1, %v3504_v9 }
 0x236   : >> { %2826 = vmatmul.msk.f32.gmra.mxu1 %vm797_vm1, %v3532_v23 }
 0x23e   : >> { %2827 = vmatmul.msk.f32.gmra.mxu1 %vm797_vm1, %v3520_v19 }
 0x243   : >> { %v879_v47 = vpop.f32.mrf.mxu1 }
 0x244   : >> { %v880_v49 = vadd.f32 %v879_v47, %v3639_v46 }
 0x246   : >> { %927 = vmax.xlane.f32.xlu1 %v880_v49 }
 0x24b   : >> { %v882_v52 = vpop.f32.mrf.mxu1 }
 0x24c   : >> { %v883_v53 = vadd.f32 %v882_v52, %v3645_v50 }
 0x24e   : >> { %929 = vmax.xlane.f32.xlu2 %v883_v53 }
 0x253   : >> { %v885_v56 = vpop.f32.mrf.mxu1 }
 0x254   : >> { %v886_v57 = vadd.f32 %v885_v56, %v3651_v55 }
 0x256   : >> { %931 = vmax.xlane.f32.xlu0 %v886_v57 }
 0x25b   : >> { %v888_v59 = vpop.f32.mrf.mxu1 }
 0x25c   : >> { %v889_v60 = vadd.f32 %v888_v59, %v3657_v58 }
 0x25e   : >> { %933 = vmax.xlane.f32.xlu2 %v889_v60 }
 0x263   : >> { %v891_v62 = vpop.f32.mrf.mxu1 }
 0x264   : >> { %v3666_v63 = vadd.f32 %v891_v62, %v3663_v61 }
 0x266   : >> { %935 = vmax.xlane.f32.xlu2 %v3666_v63 }
 0x26a   : >> { %3031 = vrot.lane.b32.xlu0 %v3671_v0, %s3237_s26 }
 0x26b   : >> { %v894_v2 = vpop.f32.mrf.mxu1 }
 0x26c   : >> { %v3681_v3 = vadd.f32 %v894_v2, %v3676_v1 }
 0x26e   : >> { %937 = vmax.xlane.f32.xlu1 %v3681_v3 }
 0x273   : >> { %v897_v7 = vpop.f32.mrf.mxu1 }
 0x274   : >> { %v3690_v11 = vadd.f32 %v897_v7, %v3687_v5 }
 0x276   : >> { %939 = vmax.xlane.f32.xlu2 %v3690_v11 }
 0x27b   : >> { %v900_v40 = vpop.f32.mrf.mxu1 }
 0x27c   : >> { %v3699_v41 = vadd.f32 %v900_v40, %v3696_v16 }
 0x27e   : >> { %941 = vmax.xlane.f32.xlu2 %v3699_v41 }
 0x283   : >> { %v903_v47 = vpop.f32.mrf.mxu1 }
 0x284   : >> { %v3723_v39 = vadd.f32 %v903_v47, %v3720_v45 }
 0x287   : >> { %3036 = vrot.lane.b32.xlu1 %v3704_v43, %s3237_s26 }
 0x28b   : >> { %v906_v52 = vpop.f32.mrf.mxu1 }
 0x293   : >> { %v909_v56 = vpop.f32.mrf.mxu1 }
 0x296   : >> { %3041 = vrot.lane.b32.xlu2 %v3710_v44, %s3237_s26  ;;  %s4544_s26 = scalar_lea.vmem %s3347_s1, %s4669_s28 }
 0x29b   : >> { %v912_v40 = vpop.f32.mrf.mxu1 }
 0x2b9   : >> { %v928_v59 = vpop.xlane.xlu1 %927 }
 0x2ba   : >> { %v959_v62 = vsub.f32 %v880_v49, %v928_v59  ;;  %v915_v59 = vpop.f32.mrf.mxu1 }
 0x2bc   : >> { %v975_v2 = vmul.f32 1.442695, %v959_v62 }
 0x2be   : >> { %3092 = vpow2.f32 %v975_v2 }
 0x2c1   : >> { %v930_v7 = vpop.xlane.xlu2 %929 }
 0x2c2   : >> { %v960_v54 = vsub.f32 %v883_v53, %v930_v7 }
 0x2c4   : >> { %v3714_v51 = vpop.eup %3092  ;;  %v977_v48 = vmul.f32 1.442695, %v960_v54 }
 0x2c5   : >> { %1007 = vadd.xlane.f32.xlu0 %v3714_v51 }
 0x2c6   : >> { %3094 = vpow2.f32 %v977_v48  ;;  %v3732_v48 = vld [vmem:[%s4644_s29 + $0x48] sm:$0xff] }
 0x2c7   : >> { %v3735_v7 = vadd.f32 %v906_v52, %v3732_v48 }
 0x2c9   : >> { %v932_v42 = vpop.xlane.xlu0 %931 }
 0x2ca   : >> { %v961_v62 = vsub.f32 %v886_v57, %v932_v42  ;;  %v918_v42 = vpop.f32.mrf.mxu1 }
 0x2cc   : >> { %v3725_v49 = vpop.eup %3094  ;;  %v979_v54 = vmul.f32 1.442695, %v961_v62 }
 0x2cd   : >> { %1009 = vadd.xlane.f32.xlu1 %v3725_v49  ;;  %943 = vmax.xlane.f32.xlu0 %v3723_v39 }
 0x2ce   : >> { %3096 = vpow2.f32 %v979_v54  ;;  %v3748_v54 = vld [vmem:[%s4644_s29 + $0x70] sm:$0xff] }
 0x2cf   : >> { %4645 = vst [vmem:[#allocation19_spill] sm:$0xff] %v3748_v54 }
 0x2d1   : >> { %v934_v53 = vpop.xlane.xlu2 %933 }
 0x2d2   : >> { %v962_v2 = vsub.f32 %v889_v60, %v934_v53  ;;  %v921_v62 = vpop.f32.mrf.mxu1  ;;  %v3753_v53 = vld [vmem:[%s4644_s29 + $0x50] sm:$0xff] }
 0x2d4   : >> { %v981_v47 = vmul.f32 1.442695, %v962_v2  ;;  %v3738_v36 = vpop.eup %3096 }
 0x2d5   : >> { %945 = vmax.xlane.f32.xlu0 %v3735_v7 }
 0x2d6   : >> { %3098 = vpow2.f32 %v981_v47 }
 0x2d9   : >> { %v936_v57 = vpop.xlane.xlu2 %935 }
 0x2da   : >> { %v963_v27 = vsub.f32 %v3666_v63, %v936_v57  ;;  %v3757_v57 = vadd.f32 %v921_v62, %v3748_v54 }
 0x2dc   : >> { %v3740_v33 = vpop.eup %3098  ;;  %v3032_v30 = vpop.permute.xlu0 %3031  ;;  %v983_v2 = vmul.f32 1.442695, %v963_v27 }
 0x2dd   : >> { %1013 = vadd.xlane.f32.xlu2 %v3740_v33  ;;  %1011 = vadd.xlane.f32.xlu0 %v3738_v36  ;;  %v3033_v60 = vunpack.i.l.bf16 %v3032_v30  ;;  %v3034_v52 = vunpack.i.h.bf16 %v3032_v30  ;;  %v3760_v30 = vadd.f32 %v909_v56, %v3753_v53  ;;  %v3774_v56 = vld [vmem:[%s4644_s29 + $0x58] sm:$0xff] }
 0x2de   : >> { %3100 = vpow2.f32 %v983_v2 }
 0x2df   : >> { %1129 = vmatpush.msra.mxu2 %v3033_v60 }
 0x2e1   : >> { %v938_v63 = vpop.xlane.xlu1 %937  ;;  %1130 = vmatpush.msra.mxu2 %v3034_v52 }
 0x2e2   : >> { %v964_v47 = vsub.f32 %v3681_v3, %v938_v63 }
 0x2e4   : >> { %v985_v60 = vmul.f32 1.442695, %v964_v47  ;;  %v3765_v21 = vpop.eup %3100  ;;  %v3787_v47 = vld [vmem:[%s4644_s29 + $0x60] sm:$0xff] }
 0x2e5   : >> { %955 = vmax.xlane.f32.xlu2 %v3757_v57  ;;  %947 = vmax.xlane.f32.xlu0 %v3760_v30  ;;  %4646 = vst [vmem:[#allocation20_spill] sm:$0xff] %v3787_v47 }
 0x2e6   : >> { %3102 = vpow2.f32 %v985_v60 }
 0x2e9   : >> { %v940_v24 = vpop.xlane.xlu2 %939 }
 0x2ea   : >> { %v965_v27 = vsub.f32 %v3690_v11, %v940_v24  ;;  %v3778_v24 = vadd.f32 %v912_v40, %v3774_v56 }
 0x2ec   : >> { %v3767_v52 = vpop.eup %3102  ;;  %v987_v3 = vmul.f32 1.442695, %v965_v27 }
 0x2ed   : >> { %1017 = vadd.xlane.f32.xlu1 %v3767_v52  ;;  %1015 = vadd.xlane.f32.xlu0 %v3765_v21 }
 0x2ee   : >> { %3104 = vpow2.f32 %v987_v3 }
 0x2f1   : >> { %v942_v62 = vpop.xlane.xlu2 %941 }
 0x2f2   : >> { %v966_v2 = vsub.f32 %v3699_v41, %v942_v62  ;;  %v3790_v41 = vadd.f32 %v915_v59, %v3787_v47  ;;  %v3804_v59 = vld [vmem:[%s4644_s29 + $0x68] sm:$0xff] }
 0x2f3   : >> { %4648 = vst [vmem:[#allocation22_spill] sm:$0xff] %v3804_v59 }
 0x2f4   : >> { %v3780_v11 = vpop.eup %3104  ;;  %v989_v63 = vmul.f32 1.442695, %v966_v2 }
 0x2f5   : >> { %1019 = vadd.xlane.f32.xlu1 %v3780_v11  ;;  %949 = vmax.xlane.f32.xlu0 %v3778_v24 }
 0x2f6   : >> { %3106 = vpow2.f32 %v989_v63  ;;  %v924_v63 = vpop.f32.mrf.mxu1 }
 0x2f9   : >> { %v3037_v60 = vpop.permute.xlu1 %3036  ;;  %v3042_v3 = vpop.permute.xlu2 %3041 }
 0x2fa   : >> { %v3038_v27 = vunpack.i.l.bf16 %v3037_v60  ;;  %v3039_v62 = vunpack.i.h.bf16 %v3037_v60  ;;  %v3043_v2 = vunpack.i.l.bf16 %v3042_v3  ;;  %v3044_v18 = vunpack.i.h.bf16 %v3042_v3 }
 0x2fb   : >> { %v3807_v60 = vadd.f32 %v924_v63, %v3799_v15 }
 0x2fc   : >> { %v3792_v40 = vpop.eup %3106  ;;  %1131 = vmatpush.msra.mxu2 %v3038_v27  ;;  %v3810_v27 = vadd.f32 %v918_v42, %v3804_v59 }
 0x2fd   : >> { %1021 = vadd.xlane.f32.xlu1 %v3792_v40  ;;  %951 = vmax.xlane.f32.xlu0 %v3790_v41 }
 0x2fe   : >> { %1132 = vmatpush.msra.mxu2 %v3039_v62 }
 0x300   : >> { %1133 = vmatpush.msra.mxu2 %v3043_v2 }
 0x302   : >> { %1134 = vmatpush.msra.mxu2 %v3044_v18 }
 0x305   : >> { %957 = vmax.xlane.f32.xlu1 %v3807_v60  ;;  %953 = vmax.xlane.f32.xlu0 %v3810_v27 }
 0x338   : >> { %v1008_v3 = vpop.xlane.xlu0 %1007 }
 0x339   : >> { %3108 = vrcp.f32 %v1008_v3 }
 0x33f   : >> { %v3109_v62 = vpop.eup %3108 }
 0x340   : >> { %v1010_v2 = vpop.xlane.xlu1 %1009  ;;  %v944_v12 = vpop.xlane.xlu0 %943  ;;  %v1055_v10 = vmul.f32 %v3109_v62, %v3714_v51 }
 0x341   : >> { %3110 = vrcp.f32 %v1010_v2  ;;  %v967_v18 = vsub.f32 %v3723_v39, %v944_v12 }
 0x342   : >> { %1135 = vmatmul.f32.vlgmr.msra.gmra.mxu2 %v1055_v10 }
 0x343   : >> { %v991_v63 = vmul.f32 1.442695, %v967_v18 }
 0x345   : >> { %3112 = vpow2.f32 %v991_v63 }
 0x347   : >> { %v3111_v54 = vpop.eup %3110 }
 0x348   : >> { %v946_v42 = vpop.xlane.xlu0 %945  ;;  %v1056_v15 = vmul.f32 %v3111_v54, %v3725_v49 }
 0x349   : >> { %v968_v59 = vsub.f32 %v3735_v7, %v946_v42 }
 0x34a   : >> { %1138 = vmatmul.f32.gmra.mxu2 %v1056_v15 }
 0x34b   : >> { %v3818_v47 = vpop.eup %3112  ;;  %v993_v3 = vmul.f32 1.442695, %v968_v59 }
 0x34c   : >> { %1023 = vadd.xlane.f32.xlu0 %v3818_v47 }
 0x34d   : >> { %3114 = vpow2.f32 %v993_v3 }
 0x350   : >> { %v1012_v51 = vpop.xlane.xlu0 %1011  ;;  %v1014_v10 = vpop.xlane.xlu2 %1013 }
 0x351   : >> { %3116 = vrcp.f32 %v1012_v51 }
 0x352   : >> { %3118 = vrcp.f32 %v1014_v10 }
 0x353   : >> { %v3821_v62 = vpop.eup %3114 }
 0x354   : >> { %1025 = vadd.xlane.f32.xlu2 %v3821_v62 }
 0x357   : >> { %v3117_v12 = vpop.eup %3116 }
 0x358   : >> { %v948_v39 = vpop.xlane.xlu0 %947  ;;  %v1057_v15 = vmul.f32 %v3117_v12, %v3738_v36  ;;  %v3119_v54 = vpop.eup %3118 }
 0x359   : >> { %v969_v49 = vsub.f32 %v3760_v30, %v948_v39  ;;  %v1058_v18 = vmul.f32 %v3119_v54, %v3740_v33  ;;  %v956_v51 = vpop.xlane.xlu2 %955 }
 0x35a   : >> { %1141 = vmatmul.f32.gmra.mxu2 %v1057_v15  ;;  %v973_v39 = vsub.f32 %v3757_v57, %v956_v51 }
 0x35b   : >> { %v995_v7 = vmul.f32 1.442695, %v969_v49 }
 0x35c   : >> { %v1003_v49 = vmul.f32 1.442695, %v973_v39 }
 0x35d   : >> { %3120 = vpow2.f32 %v995_v7 }
 0x360   : >> { %v1018_v59 = vpop.xlane.xlu1 %1017  ;;  %v1016_v2 = vpop.xlane.xlu0 %1015 }
 0x361   : >> { %3122 = vrcp.f32 %v1016_v2 }
 0x362   : >> { %1144 = vmatmul.f32.gmra.mxu2 %v1058_v18  ;;  %3124 = vrcp.f32 %v1018_v59 }
 0x363   : >> { %v3827_v63 = vpop.eup %3120 }
 0x364   : >> { %1027 = vadd.xlane.f32.xlu0 %v3827_v63 }
 0x367   : >> { %v3123_v42 = vpop.eup %3122 }
 0x368   : >> { %v1020_v3 = vpop.xlane.xlu1 %1019  ;;  %v950_v30 = vpop.xlane.xlu0 %949  ;;  %v1059_v10 = vmul.f32 %v3123_v42, %v3765_v21 }
 0x369   : >> { %v970_v36 = vsub.f32 %v3778_v24, %v950_v30  ;;  %v3125_v33 = vpop.eup %3124 }
 0x36a   : >> { %1147 = vmatmul.f32.gmra.mxu2 %v1059_v10  ;;  %v1060_v59 = vmul.f32 %v3125_v33, %v3767_v52 }
 0x36b   : >> { %v997_v12 = vmul.f32 1.442695, %v970_v36 }
 0x36d   : >> { %3126 = vpow2.f32 %v997_v12 }
 0x36e   : >> { %3128 = vrcp.f32 %v1020_v3 }
 0x36f   : >> { %3130 = vpow2.f32 %v1003_v49 }
 0x370   : >> { %v1022_v15 = vpop.xlane.xlu1 %1021  ;;  %v952_v7 = vpop.xlane.xlu0 %951 }
 0x371   : >> { %v971_v54 = vsub.f32 %v3790_v41, %v952_v7 }
 0x372   : >> { %1150 = vmatmul.f32.gmra.mxu2 %v1060_v59 }
 0x373   : >> { %v3835_v2 = vpop.eup %3126  ;;  %v999_v18 = vmul.f32 1.442695, %v971_v54 }
 0x374   : >> { %1029 = vadd.xlane.f32.xlu1 %v3835_v2  ;;  %v3129_v21 = vpop.eup %3128 }
 0x375   : >> { %3132 = vpow2.f32 %v999_v18  ;;  %v1061_v41 = vmul.f32 %v3129_v21, %v3780_v11  ;;  %v3841_v30 = vpop.eup %3130 }
 0x376   : >> { %3134 = vrcp.f32 %v1022_v15 }
 0x378   : >> { %v958_v57 = vpop.xlane.xlu1 %957  ;;  %v954_v24 = vpop.xlane.xlu0 %953 }
 0x379   : >> { %v974_v42 = vsub.f32 %v3807_v60, %v958_v57  ;;  %v972_v3 = vsub.f32 %v3810_v27, %v954_v24  ;;  %v1184_v27 = vld [vmem:[%s4590_s5] sm:$0xff] }
 0x37a   : >> { %1153 = vmatmul.f32.gmra.mxu2 %v1061_v41 }
 0x37b   : >> { %v3843_v52 = vpop.eup %3132  ;;  %v1005_v51 = vmul.f32 1.442695, %v974_v42  ;;  %v1001_v36 = vmul.f32 1.442695, %v972_v3 }
 0x37c   : >> { %1035 = vadd.xlane.f32.xlu1 %v3841_v30  ;;  %1031 = vadd.xlane.f32.xlu2 %v3843_v52  ;;  %v3135_v10 = vpop.eup %3134 }
 0x37d   : >> { %3136 = vpow2.f32 %v1005_v51  ;;  %v1062_v60 = vmul.f32 %v3135_v10, %v3792_v40  ;;  %v1185_v40 = vld [vmem:[%s4590_s5 + $0x8] sm:$0xff] }
 0x37e   : >> { %3138 = vpow2.f32 %v1001_v36  ;;  %1248 = vmatpush.msra.mxu3 %v1185_v40 }
 0x380   : >> { %1249 = vmatpush.msra.mxu3 %v1184_v27 }
 0x382   : >> { %1156 = vmatmul.f32.gmra.mxu2 %v1062_v60 }
 0x383   : >> { %v3848_v12 = vpop.eup %3136 }
 0x384   : >> { %v3850_v11 = vpop.eup %3138  ;;  %1037 = vadd.xlane.f32.xlu2 %v3848_v12 }
 0x385   : >> { %1033 = vadd.xlane.f32.xlu0 %v3850_v11 }
 0x395   : >> { %1391 = vrot.lane.b32.xlu1 %v3532_v23, %s3238_s23 }
 0x399   : >> { %1393 = vrot.lane.b32.xlu0 %v3520_v19, %s3238_s23 }
 0x39c   : >> { %1389 = vrot.lane.b32.xlu2 %v3504_v9, %s3238_s23 }
 0x39d   : >> { %1385 = vrot.lane.b32.xlu1 %v3494_v4, %s3238_s23 }
 0x3a1   : >> { %1387 = vrot.lane.b32.xlu0 %v3512_v14, %s3238_s23 }
 0x3a4   : >> { %1383 = vrot.lane.b32.xlu2 %v3498_v6, %s3238_s23 }
 0x3a5   : >> { %1379 = vrot.lane.b32.xlu1 %v3518_v17, %s3238_s23 }
 0x3a9   : >> { %1381 = vrot.lane.b32.xlu0 %v3546_v28, %s3238_s23 }
 0x3ac   : >> { %1377 = vrot.lane.b32.xlu2 %v3502_v8, %s3238_s23 }
 0x3ad   : >> { %1373 = vrot.lane.b32.xlu1 %v3530_v22, %s3238_s23 }
 0x3b1   : >> { %1375 = vrot.lane.b32.xlu0 %v3552_v29, %s3238_s23 }
 0x3b4   : >> { %1371 = vrot.lane.b32.xlu2 %v3510_v13, %s3238_s23 }
 0x3b5   : >> { %1367 = vrot.lane.b32.xlu1 %v3544_v26, %s3238_s23 }
 0x3b9   : >> { %1369 = vrot.lane.b32.xlu0 %v3562_v32, %s3238_s23 }
 0x3bc   : >> { %1365 = vrot.lane.b32.xlu2 %v3522_v20, %s3238_s23 }
 0x3bd   : >> { %1331 = vrot.lane.b32.xlu1 %v3566_v34, %s3239_s18 }
 0x3bf   : >> { %v1024_v39 = vpop.xlane.xlu0 %1023 }
 0x3c0   : >> { %3140 = vrcp.f32 %v1024_v39 }
 0x3c1   : >> { %1363 = vrot.lane.b32.xlu0 %v3566_v34, %s3238_s23 }
 0x3c4   : >> { %1333 = vrot.lane.b32.xlu2 %v3522_v20, %s3239_s18 }
 0x3c5   : >> { %1337 = vrot.lane.b32.xlu1 %v3562_v32, %s3239_s18  ;;  %v1136_v33 = vpop.f32.mrf.mxu2 }
 0x3c6   : >> { %v3141_v49 = vpop.eup %3140  ;;  %2828 = vmatmul.msk.f32.vlgmr.msra.gmra.mxu3 %vm797_vm1, %v1136_v33 }
 0x3c7   : >> { %v1026_v15 = vpop.xlane.xlu2 %1025  ;;  %v1063_v7 = vmul.f32 %v3141_v49, %v3818_v47 }
 0x3c8   : >> { %3142 = vrcp.f32 %v1026_v15 }
 0x3c9   : >> { %1335 = vrot.lane.b32.xlu0 %v3544_v26, %s3239_s18  ;;  %1159 = vmatmul.f32.gmra.mxu2 %v1063_v7 }
 0x3cc   : >> { %1339 = vrot.lane.b32.xlu2 %v3510_v13, %s3239_s18 }
 0x3cd   : >> { %1343 = vrot.lane.b32.xlu1 %v3552_v29, %s3239_s18  ;;  %v1139_v20 = vpop.f32.mrf.mxu2 }
 0x3ce   : >> { %v3143_v32 = vpop.eup %3142  ;;  %2829 = vmatmul.msk.f32.gmra.mxu3 %vm797_vm1, %v1139_v20 }
 0x3cf   : >> { %v1064_v34 = vmul.f32 %v3143_v32, %v3821_v62 }
 0x3d1   : >> { %1341 = vrot.lane.b32.xlu0 %v3530_v22, %s3239_s18  ;;  %1162 = vmatmul.f32.gmra.mxu2 %v1064_v34 }
 0x3d4   : >> { %1345 = vrot.lane.b32.xlu2 %v3502_v8, %s3239_s18 }
 0x3d5   : >> { %1349 = vrot.lane.b32.xlu1 %v3546_v28, %s3239_s18 }
 0x3d7   : >> { %v1028_v13 = vpop.xlane.xlu0 %1027 }
 0x3d8   : >> { %3144 = vrcp.f32 %v1028_v13 }
 0x3d9   : >> { %1347 = vrot.lane.b32.xlu0 %v3518_v17, %s3239_s18 }
 0x3dc   : >> { %1351 = vrot.lane.b32.xlu2 %v3498_v6, %s3239_s18 }
 0x3dd   : >> { %1355 = vrot.lane.b32.xlu1 %v3512_v14, %s3239_s18  ;;  %v1142_v26 = vpop.f32.mrf.mxu2 }
 0x3de   : >> { %v3145_v22 = vpop.eup %3144  ;;  %2830 = vmatmul.msk.f32.gmra.mxu3 %vm797_vm1, %v1142_v26 }
 0x3df   : >> { %v1065_v8 = vmul.f32 %v3145_v22, %v3827_v63 }
 0x3e1   : >> { %1353 = vrot.lane.b32.xlu0 %v3494_v4, %s3239_s18  ;;  %1165 = vmatmul.f32.gmra.mxu2 %v1065_v8 }
 0x3e4   : >> { %1357 = vrot.lane.b32.xlu2 %v3504_v9, %s3239_s18 }
 0x3e5   : >> { %1361 = vrot.lane.b32.xlu1 %v3520_v19, %s3239_s18  ;;  %v1145_v6 = vpop.f32.mrf.mxu2 }
 0x3e6   : >> { %2831 = vmatmul.msk.f32.gmra.mxu3 %vm797_vm1, %v1145_v6 }
 0x3e7   : >> { %v1030_v14 = vpop.xlane.xlu1 %1029 }
 0x3e8   : >> { %3146 = vrcp.f32 %v1030_v14 }
 0x3e9   : >> { %1359 = vrot.lane.b32.xlu0 %v3532_v23, %s3239_s18 }
 0x3ec   : >> { %3051 = vrot.lane.b32.xlu2 %v3572_v35, %s3240_s19 }
 0x3ed   : >> { %3056 = vrot.lane.b32.xlu1 %v3536_v25, %s3240_s19  ;;  %v1148_v9 = vpop.f32.mrf.mxu2 }
 0x3ee   : >> { %v3147_v4 = vpop.eup %3146  ;;  %2832 = vmatmul.msk.f32.gmra.mxu3 %vm797_vm1, %v1148_v9 }
 0x3ef   : >> { %v1032_v17 = vpop.xlane.xlu2 %1031  ;;  %v1066_v19 = vmul.f32 %v3147_v4, %v3835_v2  ;;  %v1036_v47 = vpop.xlane.xlu1 %1035 }
 0x3f0   : >> { %3148 = vrcp.f32 %v1032_v17 }
 0x3f1   : >> { %3046 = vrot.lane.b32.xlu0 %v3556_v31, %s3240_s19  ;;  %1168 = vmatmul.f32.gmra.mxu2 %v1066_v19 }
 0x3f5   : >> { %v1151_v23 = vpop.f32.mrf.mxu2 }
 0x3f6   : >> { %v3149_v28 = vpop.eup %3148  ;;  %2833 = vmatmul.msk.f32.gmra.mxu3 %vm797_vm1, %v1151_v23 }
 0x3f7   : >> { %v1038_v29 = vpop.xlane.xlu2 %1037  ;;  %v1067_v25 = vmul.f32 %v3149_v28, %v3843_v52 }
 0x3f8   : >> { %v1034_v35 = vpop.xlane.xlu0 %1033 }
 0x3f9   : >> { %3150 = vrcp.f32 %v1034_v35  ;;  %1171 = vmatmul.f32.gmra.mxu2 %v1067_v25 }
 0x3fa   : >> { %3152 = vrcp.f32 %v1036_v47 }
 0x3fb   : >> { %3154 = vrcp.f32 %v1038_v29 }
 0x3fd   : >> { %v1154_v62 = vpop.f32.mrf.mxu2 }
 0x3fe   : >> { %2834 = vmatmul.msk.f32.gmra.mxu3 %vm797_vm1, %v1154_v62 }
 0x3ff   : >> { %v3151_v63 = vpop.eup %3150  ;;  %v1390_v31 = vpop.permute.xlu2 %1389 }
 0x400   : >> { %v1068_v54 = vmul.f32 %v3151_v63, %v3850_v11  ;;  %v3153_v59 = vpop.eup %3152 }
 0x401   : >> { %v1069_v21 = vmul.f32 %v3153_v59, %v3841_v30  ;;  %v3155_v42 = vpop.eup %3154 }
 0x402   : >> { %1174 = vmatmul.f32.gmra.mxu2 %v1068_v54  ;;  %v1070_v41 = vmul.f32 %v3155_v42, %v3848_v12 }
 0x405   : >> { %v1157_v2 = vpop.f32.mrf.mxu2 }
 0x406   : >> { %2835 = vmatmul.msk.f32.gmra.mxu3 %vm797_vm1, %v1157_v2 }
 0x407   : >> { %v1392_v18 = vpop.permute.xlu1 %1391  ;;  %v1384_v57 = vpop.permute.xlu2 %1383 }
 0x40a   : >> { %1177 = vmatmul.f32.gmra.mxu2 %v1069_v21 }
 0x40b   : >> { %v1394_v24 = vpop.permute.xlu0 %1393 }
 0x40c   : >> { %2844 = vmatpush.xpose.msk.msrb.mxu3 %vm797_vm1, %v1394_v24 }
 0x40f   : >> { %v1386_v3 = vpop.permute.xlu1 %1385  ;;  %v1378_v51 = vpop.permute.xlu2 %1377 }
 0x410   : >> { %2845 = vmatpush.xpose.msk.msrb.mxu3 %vm797_vm1, %v1392_v18 }
 0x412   : >> { %1180 = vmatmul.f32.gmra.mxu2 %v1070_v41 }
 0x413   : >> { %v1388_v52 = vpop.permute.xlu0 %1387 }
 0x414   : >> { %2846 = vmatpush.xpose.msk.msrb.mxu3 %vm797_vm1, %v1390_v31 }
 0x417   : >> { %v1380_v36 = vpop.permute.xlu1 %1379  ;;  %v1372_v10 = vpop.permute.xlu2 %1371 }
 0x418   : >> { %2847 = vmatpush.xpose.msk.msrb.mxu3 %vm797_vm1, %v1388_v52 }
 0x41b   : >> { %v1382_v30 = vpop.permute.xlu0 %1381 }
 0x41c   : >> { %2848 = vmatpush.xpose.msk.msrb.mxu3 %vm797_vm1, %v1386_v3 }
 0x41f   : >> { %v1374_v60 = vpop.permute.xlu1 %1373  ;;  %v1366_v12 = vpop.permute.xlu2 %1365 }
 0x420   : >> { %2849 = vmatpush.xpose.msk.msrb.mxu3 %vm797_vm1, %v1384_v57 }
 0x423   : >> { %v1376_v11 = vpop.permute.xlu0 %1375 }
 0x424   : >> { %2850 = vmatpush.xpose.msk.msrb.mxu3 %vm797_vm1, %v1382_v30 }
 0x427   : >> { %v1368_v40 = vpop.permute.xlu1 %1367  ;;  %v3942_v33 = vpop.permute.xlu2 %1333 }
 0x428   : >> { %2851 = vmatpush.xpose.msk.msrb.mxu3 %vm797_vm1, %v1380_v36 }
 0x42b   : >> { %v1370_v27 = vpop.permute.xlu0 %1369 }
 0x42c   : >> { %2852 = vmatpush.xpose.msk.msrb.mxu3 %vm797_vm1, %v1378_v51 }
 0x42f   : >> { %v3939_v39 = vpop.permute.xlu1 %1331  ;;  %v3951_v20 = vpop.permute.xlu2 %1339 }
 0x430   : >> { %2853 = vmatpush.xpose.msk.msrb.mxu3 %vm797_vm1, %v1376_v11 }
 0x433   : >> { %v1364_v49 = vpop.permute.xlu0 %1363 }
 0x434   : >> { %2854 = vmatpush.xpose.msk.msrb.mxu3 %vm797_vm1, %v1374_v60 }
 0x437   : >> { %v3945_v15 = vpop.permute.xlu1 %1337  ;;  %v3959_v13 = vpop.permute.xlu2 %1345 }
 0x438   : >> { %2855 = vmatpush.xpose.msk.msrb.mxu3 %vm797_vm1, %v1372_v10 }
 0x43b   : >> { %v3948_v7 = vpop.permute.xlu0 %1335 }
 0x43c   : >> { %2856 = vmatpush.xpose.msk.msrb.mxu3 %vm797_vm1, %v1370_v27 }
 0x43f   : >> { %v3954_v32 = vpop.permute.xlu1 %1343  ;;  %v3968_v14 = vpop.permute.xlu2 %1351 }
 0x440   : >> { %2857 = vmatpush.xpose.msk.msrb.mxu3 %vm797_vm1, %v1368_v40 }
 0x443   : >> { %v3956_v34 = vpop.permute.xlu0 %1341 }
 0x444   : >> { %2858 = vmatpush.xpose.msk.msrb.mxu3 %vm797_vm1, %v1366_v12 }
 0x447   : >> { %v3963_v22 = vpop.permute.xlu1 %1349  ;;  %v3976_v23 = vpop.permute.xlu2 %1357 }
 0x448   : >> { %2859 = vmatpush.xpose.msk.msrb.mxu3 %vm797_vm1, %v1364_v49 }
 0x449   : >> { %v1251_v26 = vpop.f32.mrf.mxu3 }
 0x44a   : >> { %1299 = vst.msk [vmem:[#allocation2] sm:$0xff] %vm619_vm0, %v1251_v26 }
 0x44b   : >> { %v3965_v8 = vpop.permute.xlu0 %1347 }
 0x44c   : >> { %v1160_v6 = vpop.f32.mrf.mxu2 }
 0x44d   : >> { %2836 = vmatmul.msk.f32.gmra.mxu3 %vm797_vm1, %v1160_v6 }
 0x44f   : >> { %v3973_v19 = vpop.permute.xlu1 %1355  ;;  %v3052_v62 = vpop.permute.xlu2 %3051 }
 0x450   : >> { %v3053_v31 = vunpack.i.l.bf16 %v3052_v62  ;;  %v3054_v18 = vunpack.i.h.bf16 %v3052_v62 }
 0x451   : >> { %v1254_v4 = vpop.f32.mrf.mxu3 }
 0x452   : >> { %1300 = vst.msk [vmem:[#allocation2 + $0x8] sm:$0xff] %vm619_vm0, %v1254_v4 }
 0x453   : >> { %v3971_v9 = vpop.permute.xlu0 %1353 }
 0x454   : >> { %v1163_v17 = vpop.f32.mrf.mxu2 }
 0x455   : >> { %2837 = vmatmul.msk.f32.gmra.mxu3 %vm797_vm1, %v1163_v17 }
 0x457   : >> { %v3980_v29 = vpop.permute.xlu1 %1361 }
 0x45b   : >> { %v3978_v28 = vpop.permute.xlu0 %1359 }
 0x45f   : >> { %v3057_v59 = vpop.permute.xlu1 %3056 }
 0x460   : >> { %v3058_v21 = vunpack.i.l.bf16 %v3057_v59  ;;  %v3059_v57 = vunpack.i.h.bf16 %v3057_v59 }
 0x461   : >> { %v1257_v35 = vpop.f32.mrf.mxu3 }
 0x462   : >> { %1301 = vst.msk [vmem:[#allocation2 + $0x10] sm:$0xff] %vm619_vm0, %v1257_v35 }
 0x463   : >> { %v3047_v25 = vpop.permute.xlu0 %3046 }
 0x464   : >> { %v3048_v47 = vunpack.i.l.bf16 %v3047_v25  ;;  %v1166_v63 = vpop.f32.mrf.mxu2  ;;  %v3049_v54 = vunpack.i.h.bf16 %v3047_v25 }
 0x465   : >> { %2838 = vmatmul.msk.f32.gmra.mxu3 %vm797_vm1, %v1166_v63 }
 0x466   : >> { %1716 = vmatpush.msrb.mxu0 %v3048_v47 }
 0x468   : >> { %1717 = vmatpush.msrb.mxu0 %v3049_v54 }
 0x469   : >> { %v1260_v2 = vpop.f32.mrf.mxu3 }
 0x46a   : >> { %1718 = vmatpush.msrb.mxu0 %v3053_v31  ;;  %1302 = vst.msk [vmem:[#allocation2 + $0x18] sm:$0xff] %vm619_vm0, %v1260_v2 }
 0x46c   : >> { %1719 = vmatpush.msrb.mxu0 %v3054_v18 }
 0x46e   : >> { %1720 = vmatpush.msrb.mxu0 %v3058_v21 }
 0x470   : >> { %1721 = vmatpush.msrb.mxu0 %v3059_v57 }
 0x471   : >> { %v1263_v24 = vpop.f32.mrf.mxu3 }
 0x472   : >> { %1303 = vst.msk [vmem:[#allocation2 + $0x20] sm:$0xff] %vm619_vm0, %v1263_v24 }
 0x474   : >> { %v1169_v42 = vpop.f32.mrf.mxu2 }
 0x475   : >> { %2839 = vmatmul.msk.f32.gmra.mxu3 %vm797_vm1, %v1169_v42 }
 0x479   : >> { %v1266_v3 = vpop.f32.mrf.mxu3 }
 0x47a   : >> { %1304 = vst.msk [vmem:[#allocation2 + $0x28] sm:$0xff] %vm619_vm0, %v1266_v3 }
 0x47c   : >> { %v1172_v41 = vpop.f32.mrf.mxu2 }
 0x47d   : >> { %2840 = vmatmul.msk.f32.gmra.mxu3 %vm797_vm1, %v1172_v41 }
 0x481   : >> { %v1269_v52 = vpop.f32.mrf.mxu3 }
 0x482   : >> { %1305 = vst.msk [vmem:[#allocation2 + $0x30] sm:$0xff] %vm619_vm0, %v1269_v52 }
 0x485   : >> { %v1175_v51 = vpop.f32.mrf.mxu2 }
 0x486   : >> { %2841 = vmatmul.msk.f32.gmra.mxu3 %vm797_vm1, %v1175_v51  ;;  %v4650_v51 = vld [vmem:[#allocation22_spill] sm:$0xff] }
 0x489   : >> { %v1272_v36 = vpop.f32.mrf.mxu3 }
 0x48a   : >> { %1306 = vst.msk [vmem:[#allocation2 + $0x38] sm:$0xff] %vm619_vm0, %v1272_v36 }
 0x48d   : >> { %v1178_v30 = vpop.f32.mrf.mxu2 }
 0x48e   : >> { %2842 = vmatmul.msk.f32.gmra.mxu3 %vm797_vm1, %v1178_v30 }
 0x495   : >> { %v1181_v10 = vpop.f32.mrf.mxu2 }
 0x496   : >> { %2843 = vmatmul.msk.f32.gmra.mxu3 %vm797_vm1, %v1181_v10 }
 0x49e   : >> { %2860 = vmatmul.msk.f32.vlgmr.msrb.gmra.mxu3 %vm797_vm1, %v3939_v39 }
 0x4a6   : >> { %2861 = vmatmul.msk.f32.gmra.mxu3 %vm797_vm1, %v3942_v33 }
 0x4ae   : >> { %2862 = vmatmul.msk.f32.gmra.mxu3 %vm797_vm1, %v3948_v7 }
 0x4b6   : >> { %2863 = vmatmul.msk.f32.gmra.mxu3 %vm797_vm1, %v3945_v15 }
 0x4be   : >> { %2864 = vmatmul.msk.f32.gmra.mxu3 %vm797_vm1, %v3951_v20 }
 0x4c6   : >> { %2865 = vmatmul.msk.f32.gmra.mxu3 %vm797_vm1, %v3956_v34 }
 0x4ce   : >> { %2866 = vmatmul.msk.f32.gmra.mxu3 %vm797_vm1, %v3954_v32 }
 0x4d0   : >> { %v1275_v60 = vpop.f32.mrf.mxu3 }
 0x4d1   : >> { %1307 = vst.msk [vmem:[#allocation2 + $0x40] sm:$0xff] %vm619_vm0, %v1275_v60 }
 0x4d6   : >> { %2867 = vmatmul.msk.f32.gmra.mxu3 %vm797_vm1, %v3959_v13 }
 0x4d8   : >> { %v1278_v11 = vpop.f32.mrf.mxu3 }
 0x4d9   : >> { %1308 = vst.msk [vmem:[#allocation2 + $0x48] sm:$0xff] %vm619_vm0, %v1278_v11 }
 0x4de   : >> { %2868 = vmatmul.msk.f32.gmra.mxu3 %vm797_vm1, %v3965_v8 }
 0x4e6   : >> { %2869 = vmatmul.msk.f32.gmra.mxu3 %vm797_vm1, %v3963_v22 }
 0x4e8   : >> { %v1281_v40 = vpop.f32.mrf.mxu3 }
 0x4e9   : >> { %1309 = vst.msk [vmem:[#allocation2 + $0x50] sm:$0xff] %vm619_vm0, %v1281_v40 }
 0x4ee   : >> { %2870 = vmatmul.msk.f32.gmra.mxu3 %vm797_vm1, %v3968_v14 }
 0x4f6   : >> { %2871 = vmatmul.msk.f32.gmra.mxu3 %vm797_vm1, %v3971_v9 }
 0x4f8   : >> { %v1284_v12 = vpop.f32.mrf.mxu3 }
 0x4f9   : >> { %1310 = vst.msk [vmem:[#allocation2 + $0x58] sm:$0xff] %vm619_vm0, %v1284_v12 }
 0x4fe   : >> { %2872 = vmatmul.msk.f32.gmra.mxu3 %vm797_vm1, %v3973_v19 }
 0x500   : >> { %v1287_v27 = vpop.f32.mrf.mxu3 }
 0x501   : >> { %1311 = vst.msk [vmem:[#allocation2 + $0x60] sm:$0xff] %vm619_vm0, %v1287_v27 }
 0x506   : >> { %2873 = vmatmul.msk.f32.gmra.mxu3 %vm797_vm1, %v3976_v23 }
 0x509   : >> { %v1290_v39 = vpop.f32.mrf.mxu3 }
 0x50a   : >> { %1312 = vst.msk [vmem:[#allocation2 + $0x68] sm:$0xff] %vm619_vm0, %v1290_v39 }
 0x50e   : >> { %2874 = vmatmul.msk.f32.gmra.mxu3 %vm797_vm1, %v3978_v28 }
 0x511   : >> { %v1293_v33 = vpop.f32.mrf.mxu3 }
 0x512   : >> { %1313 = vst.msk [vmem:[#allocation2 + $0x70] sm:$0xff] %vm619_vm0, %v1293_v33 }
 0x516   : >> { %2875 = vmatmul.msk.f32.gmra.mxu3 %vm797_vm1, %v3980_v29 }
 0x519   : >> { %v1296_v49 = vpop.f32.mrf.mxu3 }
 0x51a   : >> { %1314 = vst.msk [vmem:[#allocation2 + $0x78] sm:$0xff] %vm619_vm0, %v1296_v49 }
 0x521   : >> { %v1476_v15 = vpop.f32.mrf.mxu3 }
 0x522   : >> { %v1477_v7 = vadd.f32 %v1476_v15, %v3639_v46 }
 0x524   : >> { %1524 = vmax.xlane.f32.xlu2 %v1477_v7 }
 0x529   : >> { %v1479_v20 = vpop.f32.mrf.mxu3 }
 0x52a   : >> { %v1480_v32 = vadd.f32 %v1479_v20, %v3645_v50 }
 0x52c   : >> { %1526 = vmax.xlane.f32.xlu0 %v1480_v32 }
 0x531   : >> { %v1482_v34 = vpop.f32.mrf.mxu3 }
 0x532   : >> { %v1483_v13 = vadd.f32 %v1482_v34, %v3651_v55 }
 0x534   : >> { %1528 = vmax.xlane.f32.xlu1 %v1483_v13 }
 0x539   : >> { %v1485_v26 = vpop.f32.mrf.mxu3 }
 0x53a   : >> { %v1486_v22 = vadd.f32 %v1485_v26, %v3657_v58 }
 0x53c   : >> { %1530 = vmax.xlane.f32.xlu2 %v1486_v22 }
 0x541   : >> { %v1488_v8 = vpop.f32.mrf.mxu3 }
 0x542   : >> { %v4051_v46 = vadd.f32 %v1488_v8, %v3663_v61 }
 0x549   : >> { %v1491_v6 = vpop.f32.mrf.mxu3 }
 0x54a   : >> { %v4039_v14 = vadd.f32 %v1491_v6, %v3676_v1 }
 0x54c   : >> { %1534 = vmax.xlane.f32.xlu0 %v4039_v14 }
 0x54d   : >> { %3066 = vrot.lane.b32.xlu1 %v3584_v38, %s3240_s19 }
 0x551   : >> { %v1494_v50 = vpop.f32.mrf.mxu3 }
 0x552   : >> { %v4055_v55 = vadd.f32 %v1494_v50, %v3687_v5 }
 0x554   : >> { %3061 = vrot.lane.b32.xlu2 %v3578_v37, %s3240_s19 }
 0x559   : >> { %v1497_v38 = vpop.f32.mrf.mxu3 }
 0x55a   : >> { %v4059_v37 = vadd.f32 %v1497_v38, %v3696_v16 }
 0x560   : >> { %3076 = vrot.lane.b32.xlu0 %v3704_v43, %s3240_s19 }
 0x561   : >> { %v1500_v58 = vpop.f32.mrf.mxu3 }
 0x562   : >> { %v4065_v61 = vadd.f32 %v1500_v58, %v3720_v45  ;;  %v4651_v58 = vld [vmem:[#allocation21_spill] sm:$0xff] }
 0x568   : >> { %3081 = vrot.lane.b32.xlu0 %v3710_v44, %s3240_s19 }
 0x569   : >> { %v1503_v35 = vpop.f32.mrf.mxu3 }
 0x56a   : >> { %v4081_v2 = vadd.f32 %v1503_v35, %v3732_v48  ;;  %v4649_v48 = vld [vmem:[#allocation20_spill] sm:$0xff] }
 0x571   : >> { %v1506_v31 = vpop.f32.mrf.mxu3 }
 0x572   : >> { %v4085_v57 = vadd.f32 %v1506_v31, %v3753_v53 }
 0x577   : >> { %1532 = vmax.xlane.f32.xlu1 %v4051_v46 }
 0x579   : >> { %v1509_v24 = vpop.f32.mrf.mxu3 }
 0x57a   : >> { %v4089_v42 = vadd.f32 %v1509_v24, %v3774_v56 }
 0x57d   : >> { %1536 = vmax.xlane.f32.xlu2 %v4055_v55 }
 0x581   : >> { %v1512_v3 = vpop.f32.mrf.mxu3 }
 0x582   : >> { %v4093_v41 = vadd.f32 %v1512_v3, %v4649_v48 }
 0x585   : >> { %1538 = vmax.xlane.f32.xlu2 %v4059_v37 }
 0x589   : >> { %v1515_v52 = vpop.f32.mrf.mxu3 }
 0x58a   : >> { %v4097_v36 = vadd.f32 %v1515_v52, %v4650_v51 }
 0x590   : >> { %3071 = vrot.lane.b32.xlu1 %v3671_v0, %s3240_s19 }
 0x592   : >> { %1540 = vmax.xlane.f32.xlu0 %v4065_v61 }
 0x597   : >> { %v1525_v44 = vpop.xlane.xlu2 %1524 }
 0x598   : >> { %v1556_v19 = vsub.f32 %v1477_v7, %v1525_v44 }
 0x59a   : >> { %v1572_v0 = vmul.f32 1.442695, %v1556_v19 }
 0x59f   : >> { %v1527_v1 = vpop.xlane.xlu0 %1526 }
 0x5a0   : >> { %v1557_v5 = vsub.f32 %v1480_v32, %v1527_v1  ;;  %v1518_v32 = vpop.f32.mrf.mxu3 }
 0x5a2   : >> { %v1574_v43 = vmul.f32 1.442695, %v1557_v5 }
 0x5a4   : >> { %3156 = vpow2.f32 %v1574_v43  ;;  %v4652_v43 = vld [vmem:[#allocation19_spill] sm:$0xff] }
 0x5a5   : >> { %v4121_v44 = vadd.f32 %v1518_v32, %v4652_v43 }
 0x5a7   : >> { %v1529_v4 = vpop.xlane.xlu1 %1528 }
 0x5a8   : >> { %v1558_v9 = vsub.f32 %v1483_v13, %v1529_v4  ;;  %v1521_v50 = vpop.f32.mrf.mxu3 }
 0x5a9   : >> { %v4118_v1 = vadd.f32 %v1521_v50, %v4651_v58 }
 0x5aa   : >> { %v4068_v16 = vpop.eup %3156  ;;  %v1576_v17 = vmul.f32 1.442695, %v1558_v9 }
 0x5ab   : >> { %1606 = vadd.xlane.f32.xlu2 %v4068_v16 }
 0x5ac   : >> { %3158 = vpow2.f32 %v1576_v17 }
 0x5ad   : >> { %3160 = vpow2.f32 %v1572_v0 }
 0x5af   : >> { %v1531_v23 = vpop.xlane.xlu2 %1530 }
 0x5b0   : >> { %v1559_v45 = vsub.f32 %v1486_v22, %v1531_v23 }
 0x5b2   : >> { %v4071_v28 = vpop.eup %3158  ;;  %v1578_v29 = vmul.f32 1.442695, %v1559_v45 }
 0x5b3   : >> { %1608 = vadd.xlane.f32.xlu2 %v4071_v28  ;;  %v4074_v62 = vpop.eup %3160 }
 0x5b4   : >> { %3162 = vpow2.f32 %v1578_v29 }
 0x5b7   : >> { %v3062_v25 = vpop.permute.xlu2 %3061 }
 0x5b8   : >> { %v3063_v47 = vunpack.i.l.bf16 %v3062_v25  ;;  %v3064_v54 = vunpack.i.h.bf16 %v3062_v25 }
 0x5ba   : >> { %v4076_v63 = vpop.eup %3162  ;;  %1604 = vadd.xlane.f32.xlu1 %v4074_v62  ;;  %1722 = vmatpush.msrb.mxu0 %v3063_v47 }
 0x5bb   : >> { %1610 = vadd.xlane.f32.xlu2 %v4076_v63 }
 0x5bc   : >> { %1723 = vmatpush.msrb.mxu0 %v3064_v54 }
 0x5bf   : >> { %v3067_v59 = vpop.permute.xlu1 %3066  ;;  %v1535_v30 = vpop.xlane.xlu0 %1534 }
 0x5c0   : >> { %v3068_v18 = vunpack.i.l.bf16 %v3067_v59  ;;  %v3069_v21 = vunpack.i.h.bf16 %v3067_v59  ;;  %v1561_v60 = vsub.f32 %v4039_v14, %v1535_v30 }
 0x5c2   : >> { %1542 = vmax.xlane.f32.xlu1 %v4081_v2  ;;  %1724 = vmatpush.msrb.mxu0 %v3068_v18  ;;  %v1582_v40 = vmul.f32 1.442695, %v1561_v60 }
 0x5c4   : >> { %1725 = vmatpush.msrb.mxu0 %v3069_v21 }
 0x5ca   : >> { %1544 = vmax.xlane.f32.xlu1 %v4085_v57 }
 0x5d2   : >> { %1546 = vmax.xlane.f32.xlu1 %v4089_v42  ;;  %v3077_v12 = vpop.permute.xlu0 %3076 }
 0x5da   : >> { %1548 = vmax.xlane.f32.xlu1 %v4093_v41  ;;  %v3082_v34 = vpop.permute.xlu0 %3081 }
 0x5db   : >> { %v3083_v5 = vunpack.i.l.bf16 %v3082_v34 }
 0x5e2   : >> { %1550 = vmax.xlane.f32.xlu1 %v4097_v36 }
 0x5ea   : >> { %v1533_v53 = vpop.xlane.xlu1 %1532 }
 0x5eb   : >> { %v1560_v10 = vsub.f32 %v4051_v46, %v1533_v53 }
 0x5ed   : >> { %v1580_v56 = vmul.f32 1.442695, %v1560_v10 }
 0x5ef   : >> { %3164 = vpow2.f32 %v1580_v56 }
 0x5f0   : >> { %v1537_v11 = vpop.xlane.xlu2 %1536  ;;  %3166 = vpow2.f32 %v1582_v40 }
 0x5f1   : >> { %v1562_v39 = vsub.f32 %v4055_v55, %v1537_v11  ;;  %v3078_v55 = vunpack.i.l.bf16 %v3077_v12 }
 0x5f3   : >> { %v1584_v15 = vmul.f32 1.442695, %v1562_v39  ;;  %v2876_v39 = vld [vmem:[%s4590_s5 + $0x10] sm:$0xff] }
 0x5f5   : >> { %v4102_v27 = vpop.eup %3164 }
 0x5f6   : >> { %1612 = vadd.xlane.f32.xlu2 %v4102_v27  ;;  %v4107_v20 = vpop.eup %3166 }
 0x5f8   : >> { %v1539_v33 = vpop.xlane.xlu2 %1538 }
 0x5f9   : >> { %v1563_v49 = vsub.f32 %v4059_v37, %v1539_v33  ;;  %v3079_v37 = vunpack.i.h.bf16 %v3077_v12 }
 0x5fb   : >> { %v1586_v7 = vmul.f32 1.442695, %v1563_v49 }
 0x5fd   : >> { %3168 = vpow2.f32 %v1586_v7 }
 0x5fe   : >> { %1614 = vadd.xlane.f32.xlu2 %v4107_v20  ;;  %3170 = vpow2.f32 %v1584_v15 }
 0x602   : >> { %v3072_v13 = vpop.permute.xlu1 %3071 }
 0x603   : >> { %v4110_v26 = vpop.eup %3168  ;;  %v3073_v22 = vunpack.i.l.bf16 %v3072_v13  ;;  %v3074_v14 = vunpack.i.h.bf16 %v3072_v13 }
 0x604   : >> { %1618 = vadd.xlane.f32.xlu0 %v4110_v26  ;;  %v4113_v8 = vpop.eup %3170 }
 0x605   : >> { %v1541_v6 = vpop.xlane.xlu0 %1540  ;;  %1726 = vmatpush.msrb.mxu0 %v3073_v22 }
 0x606   : >> { %v1564_v46 = vsub.f32 %v4065_v61, %v1541_v6  ;;  %1616 = vadd.xlane.f32.xlu2 %v4113_v8  ;;  %v3084_v61 = vunpack.i.h.bf16 %v3082_v34 }
 0x607   : >> { %1727 = vmatpush.msrb.mxu0 %v3074_v14 }
 0x608   : >> { %v1588_v38 = vmul.f32 1.442695, %v1564_v46 }
 0x609   : >> { %1728 = vmatpush.msrb.mxu0 %v3078_v55 }
 0x60a   : >> { %3172 = vpow2.f32 %v1588_v38 }
 0x60b   : >> { %1729 = vmatpush.msrb.mxu0 %v3079_v37 }
 0x60c   : >> { %1554 = vmax.xlane.f32.xlu0 %v4118_v1 }
 0x60d   : >> { %1730 = vmatpush.msrb.mxu0 %v3083_v5 }
 0x60e   : >> { %1552 = vmax.xlane.f32.xlu2 %v4121_v44 }
 0x60f   : >> { %1731 = vmatpush.msrb.mxu0 %v3084_v61 }
 0x610   : >> { %v4125_v4 = vpop.eup %3172 }
 0x611   : >> { %1620 = vadd.xlane.f32.xlu1 %v4125_v4 }
 0x61e   : >> { %v1607_v9 = vpop.xlane.xlu2 %1606 }
 0x626   : >> { %v1609_v29 = vpop.xlane.xlu2 %1608 }
 0x62d   : >> { %v1605_v17 = vpop.xlane.xlu1 %1604 }
 0x62e   : >> { %3174 = vrcp.f32 %v1605_v17  ;;  %v1611_v21 = vpop.xlane.xlu2 %1610 }
 0x62f   : >> { %3176 = vrcp.f32 %v1607_v9 }
 0x634   : >> { %v3175_v19 = vpop.eup %3174 }
 0x635   : >> { %v1543_v0 = vpop.xlane.xlu1 %1542  ;;  %v1652_v23 = vmul.f32 %v3175_v19, %v4074_v62  ;;  %v3177_v25 = vpop.eup %3176 }
 0x636   : >> { %v1565_v45 = vsub.f32 %v4081_v2, %v1543_v0  ;;  %v1653_v54 = vmul.f32 %v3177_v25, %v4068_v16 }
 0x637   : >> { %1732 = vmatmul.f32.vlgmr.msrb.gmra.mxu0 %v1652_v23 }
 0x638   : >> { %v1590_v35 = vmul.f32 1.442695, %v1565_v45 }
 0x63a   : >> { %3178 = vpow2.f32 %v1590_v35 }
 0x63b   : >> { %3180 = vrcp.f32 %v1609_v29 }
 0x63d   : >> { %v1545_v47 = vpop.xlane.xlu1 %1544 }
 0x63e   : >> { %v1566_v31 = vsub.f32 %v4085_v57, %v1545_v47 }
 0x63f   : >> { %1735 = vmatmul.f32.gmra.mxu0 %v1653_v54 }
 0x640   : >> { %v4132_v59 = vpop.eup %3178  ;;  %v1592_v18 = vmul.f32 1.442695, %v1566_v31 }
 0x641   : >> { %1622 = vadd.xlane.f32.xlu2 %v4132_v59  ;;  %v3181_v62 = vpop.eup %3180 }
 0x642   : >> { %3182 = vpow2.f32 %v1592_v18  ;;  %v1654_v24 = vmul.f32 %v3181_v62, %v4071_v28  ;;  %v2000_v18 = vld [vmem:[%s4592_s7 + $0x18] sm:$0xff] }
 0x643   : >> { %3184 = vrcp.f32 %v1611_v21  ;;  %2065 = vmatpush.msra.mxu0 %v2000_v18  ;;  %2976 = vmatpush.msrb.mxu1 %v2000_v18 }
 0x644   : >> { %2977 = vmatpush.msra.mxu3 %v2000_v18 }
 0x645   : >> { %v1547_v2 = vpop.xlane.xlu1 %1546 }
 0x646   : >> { %v1567_v3 = vsub.f32 %v4089_v42, %v1547_v2 }
 0x647   : >> { %1738 = vmatmul.f32.gmra.mxu0 %v1654_v24 }
 0x648   : >> { %v4137_v48 = vpop.eup %3182  ;;  %v1594_v16 = vmul.f32 1.442695, %v1567_v3 }
 0x649   : >> { %1624 = vadd.xlane.f32.xlu1 %v4137_v48  ;;  %v3185_v57 = vpop.eup %3184 }
 0x64a   : >> { %3186 = vpow2.f32 %v1594_v16  ;;  %v1655_v51 = vmul.f32 %v3185_v57, %v4076_v63 }
 0x64d   : >> { %v1549_v52 = vpop.xlane.xlu1 %1548 }
 0x64e   : >> { %v1568_v53 = vsub.f32 %v4093_v41, %v1549_v52 }
 0x64f   : >> { %1741 = vmatmul.f32.gmra.mxu0 %v1655_v51 }
 0x650   : >> { %v4142_v30 = vpop.eup %3186  ;;  %v1596_v10 = vmul.f32 1.442695, %v1568_v53  ;;  %v1999_v53 = vld [vmem:[%s4592_s7 + $0x10] sm:$0xff] }
 0x651   : >> { %1626 = vadd.xlane.f32.xlu0 %v4142_v30  ;;  %2066 = vmatpush.msra.mxu0 %v1999_v53 }
 0x652   : >> { %3188 = vpow2.f32 %v1596_v10  ;;  %2978 = vmatpush.msrb.mxu1 %v1999_v53  ;;  %2979 = vmatpush.msra.mxu3 %v1999_v53  ;;  %v1997_v10 = vld [vmem:[%s4592_s7] sm:$0xff] }
 0x653   : >> { %v1905_v53 = vld [vmem:[#allocation2 + $0x40] sm:$0xff] }
 0x655   : >> { %v1551_v28 = vpop.xlane.xlu1 %1550 }
 0x656   : >> { %v1569_v42 = vsub.f32 %v4097_v36, %v1551_v28  ;;  %v2877_v36 = vld [vmem:[%s4590_s5 + $0x18] sm:$0xff] }
 0x657   : >> { %1846 = vmatpush.msrb.mxu2 %v2877_v36 }
 0x658   : >> { %v4146_v56 = vpop.eup %3188  ;;  %v1598_v60 = vmul.f32 1.442695, %v1569_v42  ;;  %v1897_v42 = vld [vmem:[#allocation2] sm:$0xff] }
 0x659   : >> { %1628 = vadd.xlane.f32.xlu2 %v4146_v56  ;;  %1847 = vmatpush.msrb.mxu2 %v2876_v39  ;;  %v4653_v39 = vld [vmem:[#allocation3_spill] sm:$0xff] }
 0x65a   : >> { %3190 = vpow2.f32 %v1598_v60 }
 0x660   : >> { %v4149_v11 = vpop.eup %3190 }
 0x661   : >> { %1630 = vadd.xlane.f32.xlu1 %v4149_v11 }
 0x669   : >> { %v1613_v63 = vpop.xlane.xlu2 %1612 }
 0x66a   : >> { %3192 = vrcp.f32 %v1613_v63  ;;  %v1898_v63 = vld [vmem:[#allocation2 + $0x8] sm:$0xff] }
 0x670   : >> { %v3193_v41 = vpop.eup %3192 }
 0x671   : >> { %v1615_v40 = vpop.xlane.xlu2 %1614  ;;  %v1656_v12 = vmul.f32 %v3193_v41, %v4102_v27 }
 0x672   : >> { %3194 = vrcp.f32 %v1615_v40  ;;  %v4196_v40 = vld [vmem:[%s4591_s6] ss:$0 sm:$0xff] }
 0x673   : >> { %1744 = vmatmul.f32.gmra.mxu0 %v1656_v12 }
 0x677   : >> { %v1619_v33 = vpop.xlane.xlu0 %1618 }
 0x678   : >> { %v3195_v49 = vpop.eup %3194 }
 0x679   : >> { %v1617_v15 = vpop.xlane.xlu2 %1616  ;;  %v1657_v7 = vmul.f32 %v3195_v49, %v4107_v20 }
 0x67a   : >> { %3196 = vrcp.f32 %v1617_v15 }
 0x67b   : >> { %1747 = vmatmul.f32.gmra.mxu0 %v1657_v7  ;;  %3198 = vrcp.f32 %v1619_v33  ;;  %v1899_v7 = vld [vmem:[#allocation2 + $0x10] sm:$0xff] }
 0x67f   : >> { %v1555_v27 = vpop.xlane.xlu0 %1554 }
 0x680   : >> { %v3197_v32 = vpop.eup %3196  ;;  %v1571_v34 = vsub.f32 %v4118_v1, %v1555_v27 }
 0x681   : >> { %v1553_v13 = vpop.xlane.xlu2 %1552  ;;  %v1658_v22 = vmul.f32 %v3197_v32, %v4113_v8  ;;  %v3199_v55 = vpop.eup %3198 }
 0x682   : >> { %v1602_v6 = vmul.f32 1.442695, %v1571_v34  ;;  %v1570_v14 = vsub.f32 %v4121_v44, %v1553_v13  ;;  %v1659_v20 = vmul.f32 %v3199_v55, %v4110_v26  ;;  %v4654_v13 = vld [vmem:[#allocation4_spill] sm:$0xff] }
 0x683   : >> { %1750 = vmatmul.f32.gmra.mxu0 %v1658_v22 }
 0x684   : >> { %3200 = vpow2.f32 %v1602_v6  ;;  %v1600_v46 = vmul.f32 1.442695, %v1570_v14  ;;  %v1621_v50 = vpop.xlane.xlu1 %1620 }
 0x686   : >> { %3202 = vpow2.f32 %v1600_v46  ;;  %v1900_v46 = vld [vmem:[#allocation2 + $0x18] sm:$0xff] }
 0x687   : >> { %3204 = vrcp.f32 %v1621_v50 }
 0x68a   : >> { %v3201_v38 = vpop.eup %3200 }
 0x68b   : >> { %1634 = vadd.xlane.f32.xlu2 %v3201_v38  ;;  %1753 = vmatmul.f32.gmra.mxu0 %v1659_v20 }
 0x68c   : >> { %v3203_v37 = vpop.eup %3202 }
 0x68d   : >> { %1632 = vadd.xlane.f32.xlu0 %v3203_v37  ;;  %v3205_v58 = vpop.eup %3204 }
 0x68e   : >> { %v1660_v8 = vmul.f32 %v3205_v58, %v4125_v4 }
 0x693   : >> { %1756 = vmatmul.f32.gmra.mxu0 %v1660_v8 }
 0x6b4   : >> { %v1623_v1 = vpop.xlane.xlu2 %1622  ;;  %v1733_v5 = vpop.f32.mrf.mxu0 }
 0x6b5   : >> { %3206 = vrcp.f32 %v1623_v1  ;;  %2878 = vmatmul.msk.f32.vlgmr.msrb.gmra.mxu2 %vm797_vm1, %v1733_v5  ;;  %v4656_v5 = vld [vmem:[#allocation6_spill] sm:$0xff] }
 0x6bb   : >> { %v3207_v43 = vpop.eup %3206 }
 0x6bc   : >> { %v1625_v44 = vpop.xlane.xlu1 %1624  ;;  %v1736_v61 = vpop.f32.mrf.mxu0  ;;  %v1661_v9 = vmul.f32 %v3207_v43, %v4132_v59 }
 0x6bd   : >> { %3208 = vrcp.f32 %v1625_v44  ;;  %2879 = vmatmul.msk.f32.gmra.mxu2 %vm797_vm1, %v1736_v61 }
 0x6be   : >> { %1759 = vmatmul.f32.gmra.mxu0 %v1661_v9  ;;  %v1901_v9 = vld [vmem:[#allocation2 + $0x20] sm:$0xff] }
 0x6c3   : >> { %v3209_v26 = vpop.eup %3208 }
 0x6c4   : >> { %v1627_v17 = vpop.xlane.xlu0 %1626  ;;  %v1739_v19 = vpop.f32.mrf.mxu0  ;;  %v1662_v4 = vmul.f32 %v3209_v26, %v4137_v48 }
 0x6c5   : >> { %3210 = vrcp.f32 %v1627_v17  ;;  %2880 = vmatmul.msk.f32.gmra.mxu2 %vm797_vm1, %v1739_v19  ;;  %v1902_v19 = vld [vmem:[#allocation2 + $0x28] sm:$0xff] }
 0x6c6   : >> { %1762 = vmatmul.f32.gmra.mxu0 %v1662_v4 }
 0x6cb   : >> { %v3211_v0 = vpop.eup %3210 }
 0x6cc   : >> { %v1629_v23 = vpop.xlane.xlu2 %1628  ;;  %v1742_v45 = vpop.f32.mrf.mxu0  ;;  %v1663_v29 = vmul.f32 %v3211_v0, %v4142_v30  ;;  %v1998_v30 = vld [vmem:[%s4592_s7 + $0x8] sm:$0xff] }
 0x6cd   : >> { %3212 = vrcp.f32 %v1629_v23  ;;  %2881 = vmatmul.msk.f32.gmra.mxu2 %vm797_vm1, %v1742_v45  ;;  %2067 = vmatpush.msra.mxu0 %v1998_v30  ;;  %v4657_v23 = vld [vmem:[#allocation7_spill] sm:$0xff] }
 0x6ce   : >> { %1765 = vmatmul.f32.gmra.mxu0 %v1663_v29  ;;  %2980 = vmatpush.msrb.mxu1 %v1998_v30 }
 0x6cf   : >> { %2981 = vmatpush.msra.mxu3 %v1998_v30  ;;  %2068 = vmatpush.msra.mxu0 %v1997_v10 }
 0x6d0   : >> { %2982 = vmatpush.msrb.mxu1 %v1997_v10 }
 0x6d1   : >> { %2983 = vmatpush.msra.mxu3 %v1997_v10 }
 0x6d3   : >> { %v3213_v35 = vpop.eup %3212 }
 0x6d4   : >> { %v1631_v25 = vpop.xlane.xlu1 %1630  ;;  %v1664_v47 = vmul.f32 %v3213_v35, %v4146_v56 }
 0x6d5   : >> { %3214 = vrcp.f32 %v1631_v25  ;;  %v1903_v25 = vld [vmem:[#allocation2 + $0x30] sm:$0xff] }
 0x6d6   : >> { %1768 = vmatmul.f32.gmra.mxu0 %v1664_v47 }
 0x6db   : >> { %v3215_v54 = vpop.eup %3214 }
 0x6dc   : >> { %v1665_v31 = vmul.f32 %v3215_v54, %v4149_v11 }
 0x6de   : >> { %1771 = vmatmul.f32.gmra.mxu0 %v1665_v31 }
 0x6f0   : >> { %v1745_v59 = vpop.f32.mrf.mxu0 }
 0x6f1   : >> { %2882 = vmatmul.msk.f32.gmra.mxu2 %vm797_vm1, %v1745_v59  ;;  %v4658_v59 = vld [vmem:[#allocation8_spill] sm:$0xff] }
 0x6f8   : >> { %v1748_v21 = vpop.f32.mrf.mxu0 }
 0x6f9   : >> { %2883 = vmatmul.msk.f32.gmra.mxu2 %vm797_vm1, %v1748_v21 }
 0x6fe   : >> { %v1635_v24 = vpop.xlane.xlu2 %1634 }
 0x700   : >> { %v1633_v62 = vpop.xlane.xlu0 %1632  ;;  %v1751_v2 = vpop.f32.mrf.mxu0 }
 0x701   : >> { %3216 = vrcp.f32 %v1633_v62  ;;  %2884 = vmatmul.msk.f32.gmra.mxu2 %vm797_vm1, %v1751_v2  ;;  %v1904_v2 = vld [vmem:[#allocation2 + $0x38] sm:$0xff] }
 0x702   : >> { %3218 = vrcp.f32 %v1635_v24 }
 0x707   : >> { %v3217_v3 = vpop.eup %3216 }
 0x708   : >> { %v1754_v48 = vpop.f32.mrf.mxu0  ;;  %v1666_v16 = vmul.f32 %v3217_v3, %v3203_v37  ;;  %v3219_v57 = vpop.eup %3218 }
 0x709   : >> { %2885 = vmatmul.msk.f32.gmra.mxu2 %vm797_vm1, %v1754_v48  ;;  %v1667_v51 = vmul.f32 %v3219_v57, %v3201_v38  ;;  %v4655_v38 = vld [vmem:[#allocation5_spill] sm:$0xff] }
 0x70a   : >> { %1774 = vmatmul.f32.gmra.mxu0 %v1666_v16  ;;  %v4659_v16 = vld [vmem:[#allocation9_spill] sm:$0xff] }
 0x710   : >> { %v1757_v52 = vpop.f32.mrf.mxu0 }
 0x711   : >> { %2886 = vmatmul.msk.f32.gmra.mxu2 %vm797_vm1, %v1757_v52 }
 0x712   : >> { %1777 = vmatmul.f32.gmra.mxu0 %v1667_v51 }
 0x738   : >> { %v1849_v28 = vpop.f32.mrf.mxu2 }
 0x739   : >> { %v1913_v56 = vadd.f32 %v1897_v42, %v1849_v28  ;;  %v4660_v28 = vld [vmem:[#allocation10_spill] sm:$0xff] }
 0x73b   : >> { %1929 = vst.msk [vmem:[#allocation2] sm:$0xff] %vm619_vm0, %v1913_v56  ;;  %v1760_v60 = vpop.f32.mrf.mxu0 }
 0x73c   : >> { %2887 = vmatmul.msk.f32.gmra.mxu2 %vm797_vm1, %v1760_v60 }
 0x740   : >> { %v1852_v11 = vpop.f32.mrf.mxu2 }
 0x741   : >> { %v1914_v41 = vadd.f32 %v1898_v63, %v1852_v11  ;;  %v4661_v11 = vld [vmem:[#allocation11_spill] sm:$0xff] }
 0x742   : >> { %v1945_v12 = vld [vmem:[#allocation2] sm:$0xff] }
 0x743   : >> { %1930 = vst.msk [vmem:[#allocation2 + $0x8] sm:$0xff] %vm619_vm0, %v1914_v41  ;;  %v1763_v36 = vpop.f32.mrf.mxu0  ;;  %v1961_v33 = vadd.f32 %v1945_v12, %v4653_v39 }
 0x744   : >> { %2888 = vmatmul.msk.f32.gmra.mxu2 %vm797_vm1, %v1763_v36  ;;  %v1906_v36 = vld [vmem:[#allocation2 + $0x48] sm:$0xff] }
 0x745   : >> { %v4202_v49 = vadd.f32 %v4196_v40, %v1961_v33 }
 0x747   : >> { %2894 = vmatmul.msk.f32.vlgmr.msra.gmra.mxu0 %vm619_vm0, %v4202_v49 }
 0x748   : >> { %v1855_v15 = vpop.f32.mrf.mxu2 }
 0x749   : >> { %v1915_v27 = vadd.f32 %v1899_v7, %v1855_v15  ;;  %v1907_v15 = vld [vmem:[#allocation2 + $0x50] sm:$0xff] }
 0x74a   : >> { %v1946_v32 = vld [vmem:[#allocation2 + $0x8] sm:$0xff] }
 0x74b   : >> { %1931 = vst.msk [vmem:[#allocation2 + $0x10] sm:$0xff] %vm619_vm0, %v1915_v27  ;;  %v1766_v34 = vpop.f32.mrf.mxu0  ;;  %v1962_v22 = vadd.f32 %v1946_v32, %v4654_v13  ;;  %v4662_v32 = vld [vmem:[#allocation12_spill] sm:$0xff] }
 0x74c   : >> { %2889 = vmatmul.msk.f32.gmra.mxu2 %vm797_vm1, %v1766_v34 }
 0x74d   : >> { %v4210_v6 = vadd.f32 %v4196_v40, %v1962_v22 }
 0x74f   : >> { %2895 = vmatmul.msk.f32.gmra.mxu0 %vm619_vm0, %v4210_v6 }
 0x750   : >> { %v1858_v14 = vpop.f32.mrf.mxu2 }
 0x751   : >> { %v1916_v50 = vadd.f32 %v1900_v46, %v1858_v14  ;;  %v1908_v14 = vld [vmem:[#allocation2 + $0x58] sm:$0xff] }
 0x752   : >> { %v1947_v55 = vld [vmem:[#allocation2 + $0x10] sm:$0xff] }
 0x753   : >> { %1932 = vst.msk [vmem:[#allocation2 + $0x18] sm:$0xff] %vm619_vm0, %v1916_v50  ;;  %v1769_v20 = vpop.f32.mrf.mxu0  ;;  %v1963_v37 = vadd.f32 %v1947_v55, %v4655_v38  ;;  %v4663_v55 = vld [vmem:[#allocation13_spill] sm:$0xff] }
 0x754   : >> { %2890 = vmatmul.msk.f32.gmra.mxu2 %vm797_vm1, %v1769_v20 }
 0x755   : >> { %v4218_v58 = vadd.f32 %v4196_v40, %v1963_v37 }
 0x757   : >> { %2896 = vmatmul.msk.f32.vlgmr.msrb.gmra.mxu1 %vm619_vm0, %v4218_v58 }
 0x75a   : >> { %v1948_v8 = vld [vmem:[#allocation2 + $0x18] sm:$0xff] }
 0x75b   : >> { %v1772_v1 = vpop.f32.mrf.mxu0  ;;  %v1964_v43 = vadd.f32 %v1948_v8, %v4656_v5  ;;  %v1909_v8 = vld [vmem:[#allocation2 + $0x60] sm:$0xff] }
 0x75c   : >> { %2891 = vmatmul.msk.f32.gmra.mxu2 %vm797_vm1, %v1772_v1 }
 0x75d   : >> { %v4225_v44 = vadd.f32 %v4196_v40, %v1964_v43  ;;  %v4664_v43 = vld [vmem:[#allocation14_spill] sm:$0xff] }
 0x75f   : >> { %2897 = vmatmul.msk.f32.gmra.mxu1 %vm619_vm0, %v4225_v44 }
 0x774   : >> { %v1861_v61 = vpop.f32.mrf.mxu2 }
 0x775   : >> { %v1917_v26 = vadd.f32 %v1901_v9, %v1861_v61 }
 0x777   : >> { %1933 = vst.msk [vmem:[#allocation2 + $0x20] sm:$0xff] %vm619_vm0, %v1917_v26 }
 0x77c   : >> { %v1864_v17 = vpop.f32.mrf.mxu2 }
 0x77d   : >> { %v1918_v4 = vadd.f32 %v1902_v19, %v1864_v17  ;;  %v1910_v17 = vld [vmem:[#allocation2 + $0x68] sm:$0xff] }
 0x77e   : >> { %v1949_v0 = vld [vmem:[#allocation2 + $0x20] sm:$0xff] }
 0x77f   : >> { %1934 = vst.msk [vmem:[#allocation2 + $0x28] sm:$0xff] %vm619_vm0, %v1918_v4  ;;  %v1965_v45 = vadd.f32 %v1949_v0, %v4657_v23  ;;  %v4665_v0 = vld [vmem:[#allocation15_spill] sm:$0xff] }
 0x781   : >> { %v4233_v29 = vadd.f32 %v4196_v40, %v1965_v45 }
 0x783   : >> { %2898 = vmatmul.msk.f32.gmra.mxu1 %vm619_vm0, %v4233_v29 }
 0x784   : >> { %v1867_v35 = vpop.f32.mrf.mxu2 }
 0x785   : >> { %v1919_v47 = vadd.f32 %v1903_v25, %v1867_v35  ;;  %v4666_v25 = vld [vmem:[#allocation16_spill] sm:$0xff] }
 0x786   : >> { %v1950_v54 = vld [vmem:[#allocation2 + $0x28] sm:$0xff] }
 0x787   : >> { %1935 = vst.msk [vmem:[#allocation2 + $0x30] sm:$0xff] %vm619_vm0, %v1919_v47  ;;  %v1775_v31 = vpop.f32.mrf.mxu0  ;;  %v1966_v18 = vadd.f32 %v1950_v54, %v4658_v59  ;;  %v2140_v59 = vld [vmem:[%s4594_s9 + $0x30] sm:$0xff] }
 0x788   : >> { %2892 = vmatmul.msk.f32.gmra.mxu2 %vm797_vm1, %v1775_v31  ;;  %v2141_v31 = vld [vmem:[%s4594_s9 + $0x38] sm:$0xff] }
 0x789   : >> { %v4241_v21 = vadd.f32 %v4196_v40, %v1966_v18  ;;  %2203 = vmatpush.msrb.mxu3 %v2141_v31  ;;  %v2139_v18 = vld [vmem:[%s4594_s9 + $0x28] sm:$0xff] }
 0x78b   : >> { %2899 = vmatmul.msk.f32.gmra.mxu1 %vm619_vm0, %v4241_v21  ;;  %2204 = vmatpush.msrb.mxu3 %v2140_v59 }
 0x78c   : >> { %v1870_v62 = vpop.f32.mrf.mxu2 }
 0x78d   : >> { %v1920_v24 = vadd.f32 %v1904_v2, %v1870_v62  ;;  %2205 = vmatpush.msrb.mxu3 %v2139_v18  ;;  %v2138_v62 = vld [vmem:[%s4594_s9 + $0x20] sm:$0xff]  ;;  %v2137_v2 = vld [vmem:[%s4594_s9 + $0x18] sm:$0xff] }
 0x78e   : >> { %v1951_v3 = vld [vmem:[#allocation2 + $0x30] sm:$0xff] }
 0x78f   : >> { %1936 = vst.msk [vmem:[#allocation2 + $0x38] sm:$0xff] %vm619_vm0, %v1920_v24  ;;  %v1778_v48 = vpop.f32.mrf.mxu0  ;;  %v1967_v57 = vadd.f32 %v1951_v3, %v4659_v16  ;;  %2206 = vmatpush.msrb.mxu3 %v2138_v62  ;;  %v2136_v24 = vld [vmem:[%s4594_s9 + $0x10] sm:$0xff]  ;;  %v2135_v3 = vld [vmem:[%s4594_s9 + $0x8] sm:$0xff] }
 0x790   : >> { %2893 = vmatmul.msk.f32.gmra.mxu2 %vm797_vm1, %v1778_v48  ;;  %v2134_v48 = vld [vmem:[%s4594_s9] sm:$0xff] }
 0x791   : >> { %v4249_v52 = vadd.f32 %v4196_v40, %v1967_v57  ;;  %2207 = vmatpush.msrb.mxu3 %v2137_v2  ;;  %v1911_v57 = vld [vmem:[#allocation2 + $0x70] sm:$0xff] }
 0x793   : >> { %2900 = vmatmul.msk.f32.gmra.mxu1 %vm619_vm0, %v4249_v52  ;;  %2208 = vmatpush.msrb.mxu3 %v2136_v24 }
 0x794   : >> { %v1873_v51 = vpop.f32.mrf.mxu2 }
 0x795   : >> { %v1921_v30 = vadd.f32 %v1905_v53, %v1873_v51  ;;  %2209 = vmatpush.msrb.mxu3 %v2135_v3 }
 0x796   : >> { %v1952_v10 = vld [vmem:[#allocation2 + $0x38] sm:$0xff] }
 0x797   : >> { %1937 = vst.msk [vmem:[#allocation2 + $0x40] sm:$0xff] %vm619_vm0, %v1921_v30  ;;  %v1968_v42 = vadd.f32 %v1952_v10, %v4660_v28  ;;  %2210 = vmatpush.msrb.mxu3 %v2134_v48  ;;  %v1912_v30 = vld [vmem:[#allocation2 + $0x78] sm:$0xff] }
 0x799   : >> { %v4256_v56 = vadd.f32 %v4196_v40, %v1968_v42  ;;  %v4667_v42 = vld [vmem:[#allocation17_spill] sm:$0xff] }
 0x79b   : >> { %2901 = vmatmul.msk.f32.gmra.mxu1 %vm619_vm0, %v4256_v56 }
 0x79e   : >> { %v1953_v60 = vld [vmem:[#allocation2 + $0x40] sm:$0xff] }
 0x79f   : >> { %v1969_v63 = vadd.f32 %v1953_v60, %v4661_v11 }
 0x7a1   : >> { %v4262_v41 = vadd.f32 %v4196_v40, %v1969_v63 }
 0x7a3   : >> { %2902 = vmatmul.msk.f32.gmra.mxu1 %vm619_vm0, %v4262_v41 }
 0x7bf   : >> { %v1876_v12 = vpop.f32.mrf.mxu2 }
 0x7c0   : >> { %v1922_v39 = vadd.f32 %v1906_v36, %v1876_v12  ;;  %v4668_v12 = vld [vmem:[#allocation18_spill] sm:$0xff] }
 0x7c2   : >> { %1938 = vst.msk [vmem:[#allocation2 + $0x48] sm:$0xff] %vm619_vm0, %v1922_v39 }
 0x7c4   : >> { %v2070_v39 = vpop.f32.mrf.mxu0 }
 0x7c7   : >> { %v1879_v33 = vpop.f32.mrf.mxu2 }
 0x7c8   : >> { %v1923_v7 = vadd.f32 %v1907_v15, %v1879_v33  ;;  %v4337_v15 = vld [vmem:[%s4593_s8] ss:$0 sm:$0xff] }
 0x7c9   : >> { %v1954_v27 = vld [vmem:[#allocation2 + $0x48] sm:$0xff] }
 0x7ca   : >> { %1939 = vst.msk [vmem:[#allocation2 + $0x50] sm:$0xff] %vm619_vm0, %v1923_v7  ;;  %v1970_v34 = vadd.f32 %v1954_v27, %v4662_v32  ;;  %v2071_v27 = vadd.f32 %v4337_v15, %v2070_v39 }
 0x7cc   : >> { %v4270_v13 = vadd.f32 %v4196_v40, %v1970_v34  ;;  %v2118_v32 = vmax.f32 %v2071_v27, 0.0  ;;  %v2073_v34 = vpop.f32.mrf.mxu0  ;;  %v2432_v27 = vld [vmem:[%s4598_s13 + $0x18] sm:$0xff] }
 0x7cd   : >> { %2497 = vmatpush.msra.mxu2 %v2432_v27 }
 0x7ce   : >> { %2903 = vmatmul.msk.f32.gmra.mxu1 %vm619_vm0, %v4270_v13 }
 0x7cf   : >> { %v1882_v22 = vpop.f32.mrf.mxu2 }
 0x7d0   : >> { %v1924_v46 = vadd.f32 %v1908_v14, %v1882_v22  ;;  %v2074_v14 = vadd.f32 %v4337_v15, %v2073_v34 }
 0x7d1   : >> { %v1955_v50 = vld [vmem:[#allocation2 + $0x50] sm:$0xff] }
 0x7d2   : >> { %1940 = vst.msk [vmem:[#allocation2 + $0x58] sm:$0xff] %vm619_vm0, %v1924_v46  ;;  %v1971_v20 = vadd.f32 %v1955_v50, %v4663_v55  ;;  %v2119_v46 = vmax.f32 %v2074_v14, 0.0  ;;  %v4394_v14 = vld [vmem:[%s4595_s10] ss:$0 sm:$0xff] }
 0x7d4   : >> { %v4277_v38 = vadd.f32 %v4196_v40, %v1971_v20  ;;  %v2076_v33 = vpop.f32.mrf.mxu1 }
 0x7d6   : >> { %2904 = vmatmul.msk.f32.gmra.mxu1 %vm619_vm0, %v4277_v38 }
 0x7d7   : >> { %v1885_v37 = vpop.f32.mrf.mxu2 }
 0x7d8   : >> { %v1925_v1 = vadd.f32 %v1909_v8, %v1885_v37 }
 0x7d9   : >> { %v1956_v5 = vld [vmem:[#allocation2 + $0x58] sm:$0xff] }
 0x7da   : >> { %1941 = vst.msk [vmem:[#allocation2 + $0x60] sm:$0xff] %vm619_vm0, %v1925_v1  ;;  %v1972_v61 = vadd.f32 %v1956_v5, %v4664_v43 }
 0x7dc   : >> { %v4284_v9 = vadd.f32 %v4196_v40, %v1972_v61  ;;  %v2079_v22 = vpop.f32.mrf.mxu1 }
 0x7dd   : >> { %v2080_v37 = vadd.f32 %v4337_v15, %v2079_v22 }
 0x7de   : >> { %2905 = vmatmul.msk.f32.gmra.mxu1 %vm619_vm0, %v4284_v9 }
 0x7df   : >> { %v1888_v26 = vpop.f32.mrf.mxu2  ;;  %v2121_v8 = vmax.f32 %v2080_v37, 0.0 }
 0x7e0   : >> { %v1926_v19 = vadd.f32 %v1910_v17, %v1888_v26 }
 0x7e1   : >> { %v1957_v4 = vld [vmem:[#allocation2 + $0x60] sm:$0xff] }
 0x7e2   : >> { %1942 = vst.msk [vmem:[#allocation2 + $0x68] sm:$0xff] %vm619_vm0, %v1926_v19  ;;  %v1973_v23 = vadd.f32 %v1957_v4, %v4665_v0 }
 0x7e4   : >> { %v4291_v45 = vadd.f32 %v4196_v40, %v1973_v23 }
 0x7e6   : >> { %2906 = vmatmul.msk.f32.gmra.mxu1 %vm619_vm0, %v4291_v45 }
 0x7e9   : >> { %v1958_v35 = vld [vmem:[#allocation2 + $0x68] sm:$0xff] }
 0x7ea   : >> { %v1974_v47 = vadd.f32 %v1958_v35, %v4666_v25 }
 0x7ec   : >> { %v4297_v54 = vadd.f32 %v4196_v40, %v1974_v47 }
 0x7ee   : >> { %2907 = vmatmul.msk.f32.gmra.mxu1 %vm619_vm0, %v4297_v54 }
 0x800   : >> { %v2082_v50 = vpop.f32.mrf.mxu1 }
 0x801   : >> { %v2083_v1 = vadd.f32 %v4337_v15, %v2082_v50 }
 0x803   : >> { %v2122_v43 = vmax.f32 %v2083_v1, 0.0 }
 0x808   : >> { %v2085_v20 = vpop.f32.mrf.mxu1 }
 0x809   : >> { %v2086_v61 = vadd.f32 %v4337_v15, %v2085_v20 }
 0x80b   : >> { %v1891_v16 = vpop.f32.mrf.mxu2  ;;  %v2123_v17 = vmax.f32 %v2086_v61, 0.0 }
 0x80c   : >> { %v1927_v51 = vadd.f32 %v1911_v57, %v1891_v16 }
 0x80e   : >> { %1943 = vst.msk [vmem:[#allocation2 + $0x70] sm:$0xff] %vm619_vm0, %v1927_v51 }
 0x810   : >> { %v2088_v5 = vpop.f32.mrf.mxu1 }
 0x811   : >> { %v2089_v19 = vadd.f32 %v4337_v15, %v2088_v5  ;;  %v2431_v5 = vld [vmem:[%s4598_s13 + $0x10] sm:$0xff] }
 0x812   : >> { %2498 = vmatpush.msra.mxu2 %v2431_v5 }
 0x813   : >> { %v1894_v53 = vpop.f32.mrf.mxu2  ;;  %v2124_v4 = vmax.f32 %v2089_v19, 0.0 }
 0x814   : >> { %v1928_v10 = vadd.f32 %v1912_v30, %v1894_v53 }
 0x815   : >> { %v1959_v28 = vld [vmem:[#allocation2 + $0x70] sm:$0xff] }
 0x816   : >> { %1944 = vst.msk [vmem:[#allocation2 + $0x78] sm:$0xff] %vm619_vm0, %v1928_v10  ;;  %v1975_v60 = vadd.f32 %v1959_v28, %v4667_v42  ;;  %v2279_v10 = vld [vmem:[%s4596_s11 + $0x18] sm:$0xff]  ;;  %v2278_v42 = vld [vmem:[%s4596_s11 + $0x10] sm:$0xff] }
 0x817   : >> { %2344 = vmatpush.msrb.mxu0 %v2279_v10 }
 0x818   : >> { %v4329_v11 = vadd.f32 %v4196_v40, %v1975_v60  ;;  %v2091_v26 = vpop.f32.mrf.mxu1  ;;  %v2277_v60 = vld [vmem:[%s4596_s11 + $0x8] sm:$0xff] }
 0x819   : >> { %v2092_v23 = vadd.f32 %v4337_v15, %v2091_v26  ;;  %2345 = vmatpush.msrb.mxu0 %v2278_v42 }
 0x81a   : >> { %2908 = vmatmul.msk.f32.vlgmr.msra.gmra.mxu3 %vm619_vm0, %v4329_v11 }
 0x81b   : >> { %v2125_v35 = vmax.f32 %v2092_v23, 0.0  ;;  %2346 = vmatpush.msrb.mxu0 %v2277_v60 }
 0x81d   : >> { %v1960_v63 = vld [vmem:[#allocation2 + $0x78] sm:$0xff] }
 0x81e   : >> { %v1976_v36 = vadd.f32 %v1960_v63, %v4668_v12  ;;  %v2276_v12 = vld [vmem:[%s4596_s11] sm:$0xff] }
 0x81f   : >> { %2347 = vmatpush.msrb.mxu0 %v2276_v12 }
 0x820   : >> { %v4340_v7 = vadd.f32 %v4196_v40, %v1976_v36  ;;  %v2077_v40 = vadd.f32 %v4337_v15, %v2076_v33  ;;  %v2094_v0 = vpop.f32.mrf.mxu1 }
 0x821   : >> { %v2095_v47 = vadd.f32 %v4337_v15, %v2094_v0 }
 0x822   : >> { %2909 = vmatmul.msk.f32.gmra.mxu3 %vm619_vm0, %v4340_v7  ;;  %v2120_v55 = vmax.f32 %v2077_v40, 0.0 }
 0x823   : >> { %v2126_v31 = vmax.f32 %v2095_v47, 0.0 }
 0x82a   : >> { %2910 = vmatmul.msk.f32.vlgmr.msrb.gmra.mxu3 %vm2146_vm2, %v2118_v32 }
 0x832   : >> { %2911 = vmatmul.msk.f32.gmra.mxu3 %vm2146_vm2, %v2119_v46 }
 0x83a   : >> { %2912 = vmatmul.msk.f32.gmra.mxu3 %vm2146_vm2, %v2120_v55 }
 0x842   : >> { %2913 = vmatmul.msk.f32.gmra.mxu3 %vm2146_vm2, %v2121_v8 }
 0x84a   : >> { %2914 = vmatmul.msk.f32.gmra.mxu3 %vm2146_vm2, %v2122_v43 }
 0x84b   : >> { %v2097_v25 = vpop.f32.mrf.mxu1 }
 0x84c   : >> { %v2098_v18 = vadd.f32 %v4337_v15, %v2097_v25 }
 0x84e   : >> { %v2127_v62 = vmax.f32 %v2098_v18, 0.0 }
 0x852   : >> { %2915 = vmatmul.msk.f32.gmra.mxu3 %vm2146_vm2, %v2123_v17 }
 0x853   : >> { %v2100_v59 = vpop.f32.mrf.mxu1 }
 0x854   : >> { %v2101_v2 = vadd.f32 %v4337_v15, %v2100_v59  ;;  %v2430_v59 = vld [vmem:[%s4598_s13 + $0x8] sm:$0xff] }
 0x855   : >> { %2499 = vmatpush.msra.mxu2 %v2430_v59 }
 0x856   : >> { %v2128_v3 = vmax.f32 %v2101_v2, 0.0 }
 0x85a   : >> { %2916 = vmatmul.msk.f32.gmra.mxu3 %vm2146_vm2, %v2124_v4 }
 0x85b   : >> { %v2103_v24 = vpop.f32.mrf.mxu1 }
 0x85c   : >> { %v2104_v48 = vadd.f32 %v4337_v15, %v2103_v24 }
 0x85e   : >> { %v2129_v57 = vmax.f32 %v2104_v48, 0.0 }
 0x862   : >> { %2917 = vmatmul.msk.f32.gmra.mxu3 %vm2146_vm2, %v2125_v35 }
 0x863   : >> { %v2106_v16 = vpop.f32.mrf.mxu1 }
 0x864   : >> { %v2107_v51 = vadd.f32 %v4337_v15, %v2106_v16 }
 0x866   : >> { %v2130_v53 = vmax.f32 %v2107_v51, 0.0 }
 0x86a   : >> { %2918 = vmatmul.msk.f32.gmra.mxu3 %vm2146_vm2, %v2126_v31 }
 0x86b   : >> { %v2109_v30 = vpop.f32.mrf.mxu1 }
 0x86c   : >> { %v2110_v28 = vadd.f32 %v4337_v15, %v2109_v30 }
 0x86e   : >> { %v2131_v63 = vmax.f32 %v2110_v28, 0.0 }
 0x872   : >> { %2919 = vmatmul.msk.f32.gmra.mxu3 %vm2146_vm2, %v2127_v62 }
 0x87a   : >> { %2920 = vmatmul.msk.f32.gmra.mxu3 %vm2146_vm2, %v2128_v3 }
 0x882   : >> { %2921 = vmatmul.msk.f32.gmra.mxu3 %vm2146_vm2, %v2129_v57 }
 0x88a   : >> { %2922 = vmatmul.msk.f32.gmra.mxu3 %vm2146_vm2, %v2130_v53  ;;  %v2429_v53 = vld [vmem:[%s4598_s13] sm:$0xff] }
 0x88b   : >> { %2500 = vmatpush.msra.mxu2 %v2429_v53 }
 0x892   : >> { %2923 = vmatmul.msk.f32.gmra.mxu3 %vm2146_vm2, %v2131_v63 }
 0x89d   : >> { %v2112_v36 = vpop.f32.mrf.mxu3 }
 0x89e   : >> { %v2113_v39 = vadd.f32 %v4337_v15, %v2112_v36 }
 0x8a0   : >> { %v2132_v33 = vmax.f32 %v2113_v39, 0.0 }
 0x8a2   : >> { %2924 = vmatmul.msk.f32.gmra.mxu3 %vm2146_vm2, %v2132_v33 }
 0x8a5   : >> { %v2115_v32 = vpop.f32.mrf.mxu3 }
 0x8a6   : >> { %v2116_v34 = vadd.f32 %v4337_v15, %v2115_v32 }
 0x8a8   : >> { %v2133_v22 = vmax.f32 %v2116_v34, 0.0 }
 0x8aa   : >> { %2925 = vmatmul.msk.f32.gmra.mxu3 %vm2146_vm2, %v2133_v22 }
 0x8ad   : >> { %v2212_v46 = vpop.f32.mrf.mxu3 }
 0x8ae   : >> { %v2213_v50 = vadd.f32 %v4394_v14, %v2212_v46 }
 0x8b0   : >> { %v2260_v40 = vmax.f32 %v2213_v50, 0.0  ;;  %v4438_v50 = vld [vmem:[%s4597_s12] ss:$0 sm:$0xff] }
 0x8b2   : >> { %2926 = vmatmul.msk.f32.vlgmr.msrb.gmra.mxu0 %vm619_vm0, %v2260_v40 }
 0x8b5   : >> { %v2215_v55 = vpop.f32.mrf.mxu3 }
 0x8b6   : >> { %v2216_v20 = vadd.f32 %v4394_v14, %v2215_v55 }
 0x8b8   : >> { %v2261_v37 = vmax.f32 %v2216_v20, 0.0 }
 0x8ba   : >> { %2927 = vmatmul.msk.f32.gmra.mxu0 %vm619_vm0, %v2261_v37 }
 0x8bd   : >> { %v2218_v15 = vpop.f32.mrf.mxu3 }
 0x8be   : >> { %v2219_v8 = vadd.f32 %v4394_v14, %v2218_v15 }
 0x8c0   : >> { %v2262_v1 = vmax.f32 %v2219_v8, 0.0 }
 0x8c2   : >> { %2928 = vmatmul.msk.f32.gmra.mxu0 %vm619_vm0, %v2262_v1 }
 0x8c5   : >> { %v2221_v43 = vpop.f32.mrf.mxu3 }
 0x8c6   : >> { %v2222_v61 = vadd.f32 %v4394_v14, %v2221_v43 }
 0x8c8   : >> { %v2263_v26 = vmax.f32 %v2222_v61, 0.0 }
 0x8ca   : >> { %2929 = vmatmul.msk.f32.gmra.mxu0 %vm619_vm0, %v2263_v26 }
 0x8cd   : >> { %v2224_v17 = vpop.f32.mrf.mxu3 }
 0x8ce   : >> { %v2225_v19 = vadd.f32 %v4394_v14, %v2224_v17 }
 0x8d0   : >> { %v2264_v4 = vmax.f32 %v2225_v19, 0.0 }
 0x8d2   : >> { %2930 = vmatmul.msk.f32.gmra.mxu0 %vm619_vm0, %v2264_v4 }
 0x8d5   : >> { %v2227_v0 = vpop.f32.mrf.mxu3 }
 0x8d6   : >> { %v2228_v23 = vadd.f32 %v4394_v14, %v2227_v0 }
 0x8d8   : >> { %v2265_v35 = vmax.f32 %v2228_v23, 0.0 }
 0x8da   : >> { %2931 = vmatmul.msk.f32.gmra.mxu0 %vm619_vm0, %v2265_v35 }
 0x8dd   : >> { %v2230_v25 = vpop.f32.mrf.mxu3 }
 0x8de   : >> { %v2231_v47 = vadd.f32 %v4394_v14, %v2230_v25 }
 0x8e0   : >> { %v2266_v31 = vmax.f32 %v2231_v47, 0.0 }
 0x8e2   : >> { %2932 = vmatmul.msk.f32.gmra.mxu0 %vm619_vm0, %v2266_v31 }
 0x8e5   : >> { %v2233_v18 = vpop.f32.mrf.mxu3 }
 0x8e6   : >> { %v2234_v62 = vadd.f32 %v4394_v14, %v2233_v18 }
 0x8e8   : >> { %v2267_v2 = vmax.f32 %v2234_v62, 0.0 }
 0x8ea   : >> { %2933 = vmatmul.msk.f32.gmra.mxu0 %vm619_vm0, %v2267_v2 }
 0x8ed   : >> { %v2236_v24 = vpop.f32.mrf.mxu3 }
 0x8ee   : >> { %v2237_v3 = vadd.f32 %v4394_v14, %v2236_v24 }
 0x8f0   : >> { %v2268_v48 = vmax.f32 %v2237_v3, 0.0 }
 0x8f2   : >> { %2934 = vmatmul.msk.f32.gmra.mxu0 %vm619_vm0, %v2268_v48 }
 0x8f5   : >> { %v2239_v16 = vpop.f32.mrf.mxu3 }
 0x8f6   : >> { %v2240_v57 = vadd.f32 %v4394_v14, %v2239_v16 }
 0x8f8   : >> { %v2269_v51 = vmax.f32 %v2240_v57, 0.0 }
 0x8fa   : >> { %2935 = vmatmul.msk.f32.gmra.mxu0 %vm619_vm0, %v2269_v51 }
 0x8fd   : >> { %v2242_v30 = vpop.f32.mrf.mxu3 }
 0x8fe   : >> { %v2243_v10 = vadd.f32 %v4394_v14, %v2242_v30 }
 0x900   : >> { %v2270_v28 = vmax.f32 %v2243_v10, 0.0 }
 0x902   : >> { %2936 = vmatmul.msk.f32.gmra.mxu0 %vm619_vm0, %v2270_v28 }
 0x905   : >> { %v2245_v42 = vpop.f32.mrf.mxu3 }
 0x906   : >> { %v2246_v60 = vadd.f32 %v4394_v14, %v2245_v42 }
 0x908   : >> { %v2271_v63 = vmax.f32 %v2246_v60, 0.0 }
 0x90a   : >> { %2937 = vmatmul.msk.f32.gmra.mxu0 %vm619_vm0, %v2271_v63 }
 0x90d   : >> { %v2248_v12 = vpop.f32.mrf.mxu3 }
 0x90e   : >> { %v2249_v36 = vadd.f32 %v4394_v14, %v2248_v12 }
 0x910   : >> { %v2272_v39 = vmax.f32 %v2249_v36, 0.0 }
 0x912   : >> { %2938 = vmatmul.msk.f32.gmra.mxu0 %vm619_vm0, %v2272_v39 }
 0x915   : >> { %v2251_v33 = vpop.f32.mrf.mxu3 }
 0x916   : >> { %v2252_v27 = vadd.f32 %v4394_v14, %v2251_v33 }
 0x918   : >> { %v2273_v32 = vmax.f32 %v2252_v27, 0.0 }
 0x91a   : >> { %2939 = vmatmul.msk.f32.gmra.mxu0 %vm619_vm0, %v2273_v32 }
 0x925   : >> { %v2254_v34 = vpop.f32.mrf.mxu3 }
 0x926   : >> { %v2255_v22 = vadd.f32 %v4394_v14, %v2254_v34 }
 0x928   : >> { %v2274_v46 = vmax.f32 %v2255_v22, 0.0 }
 0x92a   : >> { %2940 = vmatmul.msk.f32.gmra.mxu0 %vm619_vm0, %v2274_v46 }
 0x92d   : >> { %v2257_v40 = vpop.f32.mrf.mxu3 }
 0x92e   : >> { %v2258_v55 = vadd.f32 %v4394_v14, %v2257_v40 }
 0x92f   : >> { %v2349_v20 = vpop.f32.mrf.mxu0 }
 0x930   : >> { %v2275_v37 = vmax.f32 %v2258_v55, 0.0  ;;  %v2350_v15 = vadd.f32 %v4438_v50, %v2349_v20 }
 0x932   : >> { %v2397_v8 = vadd.f32 %v2350_v15, %v4202_v49  ;;  %2941 = vmatmul.msk.f32.gmra.mxu0 %vm619_vm0, %v2275_v37  ;;  %v2569_v49 = vld [vmem:[%s4600_s15 + $0x18] sm:$0xff] }
 0x933   : >> { %2634 = vmatpush.msra.mxu1 %v2569_v49 }
 0x934   : >> { %v2413_v1 = vmax.f32 %v2397_v8, 0.0 }
 0x936   : >> { %2942 = vmatmul.msk.f32.vlgmr.msra.gmra.mxu2 %vm619_vm0, %v2413_v1 }
 0x937   : >> { %v2352_v5 = vpop.f32.mrf.mxu0 }
 0x938   : >> { %v2353_v43 = vadd.f32 %v4438_v50, %v2352_v5 }
 0x93a   : >> { %v2398_v61 = vadd.f32 %v2353_v43, %v4210_v6 }
 0x93c   : >> { %v2414_v26 = vmax.f32 %v2398_v61, 0.0 }
 0x93e   : >> { %2943 = vmatmul.msk.f32.gmra.mxu2 %vm619_vm0, %v2414_v26 }
 0x93f   : >> { %v2355_v14 = vpop.f32.mrf.mxu0 }
 0x940   : >> { %v2356_v17 = vadd.f32 %v4438_v50, %v2355_v14 }
 0x942   : >> { %v2399_v19 = vadd.f32 %v2356_v17, %v4218_v58 }
 0x944   : >> { %v2415_v4 = vmax.f32 %v2399_v19, 0.0 }
 0x946   : >> { %2944 = vmatmul.msk.f32.gmra.mxu2 %vm619_vm0, %v2415_v4 }
 0x947   : >> { %v2358_v0 = vpop.f32.mrf.mxu0 }
 0x948   : >> { %v2359_v23 = vadd.f32 %v4438_v50, %v2358_v0 }
 0x94a   : >> { %v2400_v6 = vadd.f32 %v2359_v23, %v4225_v44  ;;  %v2568_v44 = vld [vmem:[%s4600_s15 + $0x10] sm:$0xff] }
 0x94b   : >> { %2635 = vmatpush.msra.mxu1 %v2568_v44 }
 0x94c   : >> { %v2416_v35 = vmax.f32 %v2400_v6, 0.0 }
 0x94e   : >> { %2945 = vmatmul.msk.f32.gmra.mxu2 %vm619_vm0, %v2416_v35 }
 0x94f   : >> { %v2361_v25 = vpop.f32.mrf.mxu0 }
 0x950   : >> { %v2362_v47 = vadd.f32 %v4438_v50, %v2361_v25 }
 0x952   : >> { %v2401_v58 = vadd.f32 %v2362_v47, %v4233_v29 }
 0x954   : >> { %v2417_v31 = vmax.f32 %v2401_v58, 0.0 }
 0x956   : >> { %2946 = vmatmul.msk.f32.gmra.mxu2 %vm619_vm0, %v2417_v31 }
 0x957   : >> { %v2364_v59 = vpop.f32.mrf.mxu0 }
 0x958   : >> { %v2365_v18 = vadd.f32 %v4438_v50, %v2364_v59 }
 0x95a   : >> { %v2402_v62 = vadd.f32 %v2365_v18, %v4241_v21 }
 0x95c   : >> { %v2418_v2 = vmax.f32 %v2402_v62, 0.0 }
 0x95e   : >> { %2947 = vmatmul.msk.f32.gmra.mxu2 %vm619_vm0, %v2418_v2 }
 0x95f   : >> { %v2367_v24 = vpop.f32.mrf.mxu0 }
 0x960   : >> { %v2368_v3 = vadd.f32 %v4438_v50, %v2367_v24 }
 0x962   : >> { %v2403_v29 = vadd.f32 %v2368_v3, %v4249_v52  ;;  %v2567_v52 = vld [vmem:[%s4600_s15 + $0x8] sm:$0xff] }
 0x963   : >> { %2636 = vmatpush.msra.mxu1 %v2567_v52 }
 0x964   : >> { %v2419_v48 = vmax.f32 %v2403_v29, 0.0 }
 0x966   : >> { %2948 = vmatmul.msk.f32.gmra.mxu2 %vm619_vm0, %v2419_v48 }
 0x967   : >> { %v2370_v16 = vpop.f32.mrf.mxu0 }
 0x968   : >> { %v2371_v57 = vadd.f32 %v4438_v50, %v2370_v16 }
 0x96a   : >> { %v2404_v21 = vadd.f32 %v2371_v57, %v4256_v56 }
 0x96c   : >> { %v2420_v51 = vmax.f32 %v2404_v21, 0.0 }
 0x96e   : >> { %2949 = vmatmul.msk.f32.gmra.mxu2 %vm619_vm0, %v2420_v51 }
 0x96f   : >> { %v2373_v53 = vpop.f32.mrf.mxu0 }
 0x970   : >> { %v2374_v30 = vadd.f32 %v4438_v50, %v2373_v53 }
 0x972   : >> { %v2405_v10 = vadd.f32 %v2374_v30, %v4262_v41 }
 0x974   : >> { %v2421_v28 = vmax.f32 %v2405_v10, 0.0 }
 0x976   : >> { %2950 = vmatmul.msk.f32.gmra.mxu2 %vm619_vm0, %v2421_v28 }
 0x977   : >> { %v2376_v42 = vpop.f32.mrf.mxu0 }
 0x978   : >> { %v2377_v60 = vadd.f32 %v4438_v50, %v2376_v42 }
 0x97a   : >> { %v2406_v56 = vadd.f32 %v2377_v60, %v4270_v13  ;;  %v2566_v13 = vld [vmem:[%s4600_s15] sm:$0xff] }
 0x97b   : >> { %2637 = vmatpush.msra.mxu1 %v2566_v13 }
 0x97c   : >> { %v2422_v63 = vmax.f32 %v2406_v56, 0.0 }
 0x97e   : >> { %2951 = vmatmul.msk.f32.gmra.mxu2 %vm619_vm0, %v2422_v63 }
 0x97f   : >> { %v2379_v12 = vpop.f32.mrf.mxu0 }
 0x980   : >> { %v2380_v36 = vadd.f32 %v4438_v50, %v2379_v12 }
 0x982   : >> { %v2407_v41 = vadd.f32 %v2380_v36, %v4277_v38 }
 0x984   : >> { %v2423_v39 = vmax.f32 %v2407_v41, 0.0 }
 0x986   : >> { %2952 = vmatmul.msk.f32.gmra.mxu2 %vm619_vm0, %v2423_v39 }
 0x987   : >> { %v2382_v33 = vpop.f32.mrf.mxu0 }
 0x988   : >> { %v2383_v27 = vadd.f32 %v4438_v50, %v2382_v33 }
 0x98a   : >> { %v2408_v32 = vadd.f32 %v2383_v27, %v4284_v9 }
 0x98c   : >> { %v2424_v34 = vmax.f32 %v2408_v32, 0.0 }
 0x98e   : >> { %2953 = vmatmul.msk.f32.gmra.mxu2 %vm619_vm0, %v2424_v34  ;;  %v3091_v34 = vld [vmem:[%s4601_s16] ss:$0 sm:$0xff] }
 0x98f   : >> { %v2385_v22 = vpop.f32.mrf.mxu0 }
 0x990   : >> { %v2386_v46 = vadd.f32 %v4438_v50, %v2385_v22 }
 0x992   : >> { %v2409_v38 = vadd.f32 %v2386_v46, %v4291_v45 }
 0x994   : >> { %v2425_v40 = vmax.f32 %v2409_v38, 0.0 }
 0x996   : >> { %2954 = vmatmul.msk.f32.gmra.mxu2 %vm619_vm0, %v2425_v40 }
 0x997   : >> { %v2388_v55 = vpop.f32.mrf.mxu0 }
 0x998   : >> { %v2389_v20 = vadd.f32 %v4438_v50, %v2388_v55 }
 0x99a   : >> { %v2410_v9 = vadd.f32 %v2389_v20, %v4297_v54  ;;  %v4505_v54 = vld [vmem:[%s4599_s14] ss:$0 sm:$0xff] }
 0x99c   : >> { %v2426_v37 = vmax.f32 %v2410_v9, 0.0 }
 0x99e   : >> { %2955 = vmatmul.msk.f32.gmra.mxu2 %vm619_vm0, %v2426_v37 }
 0x9a7   : >> { %v2391_v15 = vpop.f32.mrf.mxu0 }
 0x9a8   : >> { %v2392_v8 = vadd.f32 %v4438_v50, %v2391_v15 }
 0x9aa   : >> { %v2411_v1 = vadd.f32 %v2392_v8, %v4329_v11 }
 0x9ac   : >> { %v2427_v5 = vmax.f32 %v2411_v1, 0.0 }
 0x9ae   : >> { %2956 = vmatmul.msk.f32.gmra.mxu2 %vm619_vm0, %v2427_v5 }
 0x9af   : >> { %v2394_v45 = vpop.f32.mrf.mxu0 }
 0x9b0   : >> { %v2395_v43 = vadd.f32 %v4438_v50, %v2394_v45 }
 0x9b2   : >> { %v2412_v61 = vadd.f32 %v2395_v43, %v4340_v7 }
 0x9b4   : >> { %v2428_v26 = vmax.f32 %v2412_v61, 0.0 }
 0x9b6   : >> { %2957 = vmatmul.msk.f32.gmra.mxu2 %vm619_vm0, %v2428_v26 }
 0x9b9   : >> { %v2502_v14 = vpop.f32.mrf.mxu2 }
 0x9ba   : >> { %v2503_v17 = vadd.f32 %v4505_v54, %v2502_v14 }
 0x9bc   : >> { %v2550_v11 = vmax.f32 %v2503_v17, 0.0 }
 0x9be   : >> { %2958 = vmatmul.msk.f32.vlgmr.msra.gmra.mxu1 %vm619_vm0, %v2550_v11 }
 0x9c1   : >> { %v2505_v19 = vpop.f32.mrf.mxu2 }
 0x9c2   : >> { %v2506_v4 = vadd.f32 %v4505_v54, %v2505_v19 }
 0x9c4   : >> { %v2551_v50 = vmax.f32 %v2506_v4, 0.0 }
 0x9c6   : >> { %2959 = vmatmul.msk.f32.gmra.mxu1 %vm619_vm0, %v2551_v50 }
 0x9c9   : >> { %v2508_v7 = vpop.f32.mrf.mxu2 }
 0x9ca   : >> { %v2509_v49 = vadd.f32 %v4505_v54, %v2508_v7 }
 0x9cc   : >> { %v2552_v0 = vmax.f32 %v2509_v49, 0.0 }
 0x9ce   : >> { %2960 = vmatmul.msk.f32.gmra.mxu1 %vm619_vm0, %v2552_v0 }
 0x9d1   : >> { %v2511_v23 = vpop.f32.mrf.mxu2 }
 0x9d2   : >> { %v2512_v6 = vadd.f32 %v4505_v54, %v2511_v23 }
 0x9d4   : >> { %v2553_v35 = vmax.f32 %v2512_v6, 0.0 }
 0x9d6   : >> { %2961 = vmatmul.msk.f32.gmra.mxu1 %vm619_vm0, %v2553_v35 }
 0x9d9   : >> { %v2514_v25 = vpop.f32.mrf.mxu2 }
 0x9da   : >> { %v2515_v47 = vadd.f32 %v4505_v54, %v2514_v25 }
 0x9dc   : >> { %v2554_v58 = vmax.f32 %v2515_v47, 0.0 }
 0x9de   : >> { %2962 = vmatmul.msk.f32.gmra.mxu1 %vm619_vm0, %v2554_v58 }
 0x9e1   : >> { %v2517_v31 = vpop.f32.mrf.mxu2 }
 0x9e2   : >> { %v2518_v59 = vadd.f32 %v4505_v54, %v2517_v31 }
 0x9e4   : >> { %v2555_v18 = vmax.f32 %v2518_v59, 0.0 }
 0x9e6   : >> { %2963 = vmatmul.msk.f32.gmra.mxu1 %vm619_vm0, %v2555_v18 }
 0x9e9   : >> { %v2520_v62 = vpop.f32.mrf.mxu2 }
 0x9ea   : >> { %v2521_v2 = vadd.f32 %v4505_v54, %v2520_v62 }
 0x9ec   : >> { %v2556_v44 = vmax.f32 %v2521_v2, 0.0 }
 0x9ee   : >> { %2964 = vmatmul.msk.f32.gmra.mxu1 %vm619_vm0, %v2556_v44 }
 0x9f1   : >> { %v2523_v24 = vpop.f32.mrf.mxu2 }
 0x9f2   : >> { %v2524_v3 = vadd.f32 %v4505_v54, %v2523_v24 }
 0x9f4   : >> { %v2557_v29 = vmax.f32 %v2524_v3, 0.0 }
 0x9f6   : >> { %2965 = vmatmul.msk.f32.gmra.mxu1 %vm619_vm0, %v2557_v29 }
 0x9f9   : >> { %v2526_v48 = vpop.f32.mrf.mxu2 }
 0x9fa   : >> { %v2527_v16 = vadd.f32 %v4505_v54, %v2526_v48 }
 0x9fc   : >> { %v2558_v57 = vmax.f32 %v2527_v16, 0.0 }
 0x9fe   : >> { %2966 = vmatmul.msk.f32.gmra.mxu1 %vm619_vm0, %v2558_v57 }
 0xa01   : >> { %v2529_v21 = vpop.f32.mrf.mxu2 }
 0xa02   : >> { %v2530_v51 = vadd.f32 %v4505_v54, %v2529_v21 }
 0xa04   : >> { %v2559_v53 = vmax.f32 %v2530_v51, 0.0 }
 0xa06   : >> { %2967 = vmatmul.msk.f32.gmra.mxu1 %vm619_vm0, %v2559_v53 }
 0xa09   : >> { %v2532_v30 = vpop.f32.mrf.mxu2 }
 0xa0a   : >> { %v2533_v10 = vadd.f32 %v4505_v54, %v2532_v30 }
 0xa0c   : >> { %v2560_v28 = vmax.f32 %v2533_v10, 0.0 }
 0xa0e   : >> { %2968 = vmatmul.msk.f32.gmra.mxu1 %vm619_vm0, %v2560_v28 }
 0xa11   : >> { %v2535_v52 = vpop.f32.mrf.mxu2 }
 0xa12   : >> { %v2536_v42 = vadd.f32 %v4505_v54, %v2535_v52 }
 0xa14   : >> { %v2561_v60 = vmax.f32 %v2536_v42, 0.0 }
 0xa16   : >> { %2969 = vmatmul.msk.f32.gmra.mxu1 %vm619_vm0, %v2561_v60 }
 0xa19   : >> { %v2538_v56 = vpop.f32.mrf.mxu2 }
 0xa1a   : >> { %v2539_v63 = vadd.f32 %v4505_v54, %v2538_v56 }
 0xa1c   : >> { %v2562_v12 = vmax.f32 %v2539_v63, 0.0 }
 0xa1e   : >> { %2970 = vmatmul.msk.f32.gmra.mxu1 %vm619_vm0, %v2562_v12 }
 0xa21   : >> { %v2541_v36 = vpop.f32.mrf.mxu2 }
 0xa22   : >> { %v2542_v41 = vadd.f32 %v4505_v54, %v2541_v36 }
 0xa24   : >> { %v2563_v39 = vmax.f32 %v2542_v41, 0.0 }
 0xa26   : >> { %2971 = vmatmul.msk.f32.gmra.mxu1 %vm619_vm0, %v2563_v39 }
 0xa31   : >> { %v2544_v33 = vpop.f32.mrf.mxu2 }
 0xa32   : >> { %v2545_v27 = vadd.f32 %v4505_v54, %v2544_v33 }
 0xa34   : >> { %v2564_v32 = vmax.f32 %v2545_v27, 0.0 }
 0xa36   : >> { %2972 = vmatmul.msk.f32.gmra.mxu1 %vm619_vm0, %v2564_v32 }
 0xa39   : >> { %v2547_v13 = vpop.f32.mrf.mxu2 }
 0xa3a   : >> { %v2548_v22 = vadd.f32 %v4505_v54, %v2547_v13 }
 0xa3b   : >> { %v2639_v46 = vpop.f32.mrf.mxu1 }
 0xa3c   : >> { %v2565_v38 = vmax.f32 %v2548_v22, 0.0  ;;  %v2640_v40 = vadd.f32 %v3091_v34, %v2639_v46 }
 0xa3e   : >> { %2689 = vst.msk [vmem:[%s4544_s26] sm:$0xff] %vm2688_vm3, %v2640_v40  ;;  %2973 = vmatmul.msk.f32.gmra.mxu1 %vm619_vm0, %v2565_v38 }
 0xa43   : >> { %v2642_v55 = vpop.f32.mrf.mxu1 }
 0xa44   : >> { %v2643_v20 = vadd.f32 %v3091_v34, %v2642_v55 }
 0xa46   : >> { %2690 = vst.msk [vmem:[%s4544_s26 + $0x8] sm:$0xff] %vm2688_vm3, %v2643_v20 }
 0xa4b   : >> { %v2645_v9 = vpop.f32.mrf.mxu1 }
 0xa4c   : >> { %v2646_v37 = vadd.f32 %v3091_v34, %v2645_v9 }
 0xa4e   : >> { %2691 = vst.msk [vmem:[%s4544_s26 + $0x10] sm:$0xff] %vm2688_vm3, %v2646_v37 }
 0xa53   : >> { %v2648_v15 = vpop.f32.mrf.mxu1 }
 0xa54   : >> { %v2649_v8 = vadd.f32 %v3091_v34, %v2648_v15 }
 0xa56   : >> { %2692 = vst.msk [vmem:[%s4544_s26 + $0x18] sm:$0xff] %vm2688_vm3, %v2649_v8 }
 0xa5b   : >> { %v2651_v1 = vpop.f32.mrf.mxu1 }
 0xa5c   : >> { %v2652_v5 = vadd.f32 %v3091_v34, %v2651_v1 }
 0xa5e   : >> { %2693 = vst.msk [vmem:[%s4544_s26 + $0x20] sm:$0xff] %vm2688_vm3, %v2652_v5 }
 0xa63   : >> { %v2654_v45 = vpop.f32.mrf.mxu1 }
 0xa64   : >> { %v2655_v43 = vadd.f32 %v3091_v34, %v2654_v45 }
 0xa66   : >> { %2694 = vst.msk [vmem:[%s4544_s26 + $0x28] sm:$0xff] %vm2688_vm3, %v2655_v43 }
 0xa6b   : >> { %v2657_v61 = vpop.f32.mrf.mxu1 }
 0xa6c   : >> { %v2658_v26 = vadd.f32 %v3091_v34, %v2657_v61 }
 0xa6e   : >> { %2695 = vst.msk [vmem:[%s4544_s26 + $0x30] sm:$0xff] %vm2688_vm3, %v2658_v26 }
 0xa73   : >> { %v2660_v54 = vpop.f32.mrf.mxu1 }
 0xa74   : >> { %v2661_v14 = vadd.f32 %v3091_v34, %v2660_v54 }
 0xa76   : >> { %2696 = vst.msk [vmem:[%s4544_s26 + $0x38] sm:$0xff] %vm2688_vm3, %v2661_v14 }
 0xa7b   : >> { %v2663_v17 = vpop.f32.mrf.mxu1 }
 0xa7c   : >> { %v2664_v11 = vadd.f32 %v3091_v34, %v2663_v17 }
 0xa7e   : >> { %2697 = vst.msk [vmem:[%s4544_s26 + $0x40] sm:$0xff] %vm2688_vm3, %v2664_v11 }
 0xa83   : >> { %v2666_v19 = vpop.f32.mrf.mxu1 }
 0xa84   : >> { %v2667_v4 = vadd.f32 %v3091_v34, %v2666_v19 }
 0xa86   : >> { %2698 = vst.msk [vmem:[%s4544_s26 + $0x48] sm:$0xff] %vm2688_vm3, %v2667_v4 }
 0xa8b   : >> { %v2669_v50 = vpop.f32.mrf.mxu1 }
 0xa8c   : >> { %v2670_v7 = vadd.f32 %v3091_v34, %v2669_v50 }
 0xa8e   : >> { %2699 = vst.msk [vmem:[%s4544_s26 + $0x50] sm:$0xff] %vm2688_vm3, %v2670_v7 }
 0xa93   : >> { %v2672_v49 = vpop.f32.mrf.mxu1 }
 0xa94   : >> { %v2673_v0 = vadd.f32 %v3091_v34, %v2672_v49 }
 0xa96   : >> { %2700 = vst.msk [vmem:[%s4544_s26 + $0x58] sm:$0xff] %vm2688_vm3, %v2673_v0 }
 0xa9b   : >> { %v2675_v23 = vpop.f32.mrf.mxu1 }
 0xa9c   : >> { %v2676_v6 = vadd.f32 %v3091_v34, %v2675_v23 }
 0xa9e   : >> { %2701 = vst.msk [vmem:[%s4544_s26 + $0x60] sm:$0xff] %vm2688_vm3, %v2676_v6 }
 0xaa3   : >> { %v2678_v35 = vpop.f32.mrf.mxu1 }
 0xaa4   : >> { %v2679_v25 = vadd.f32 %v3091_v34, %v2678_v35 }
 0xaa6   : >> { %2702 = vst.msk [vmem:[%s4544_s26 + $0x68] sm:$0xff] %vm2688_vm3, %v2679_v25 }
 0xab3   : >> { %v2681_v47 = vpop.f32.mrf.mxu1 }
 0xab4   : >> { %v2682_v58 = vadd.f32 %v3091_v34, %v2681_v47 }
 0xab6   : >> { %2703 = vst.msk [vmem:[%s4544_s26 + $0x70] sm:$0xff] %vm2688_vm3, %v2682_v58 }
 0xaba   : > { %556 = sbr.rel (!%p554_p4) target bundleno = 16 (0x10), region = 128 }
 0xabb   : >> { %v2684_v31 = vpop.f32.mrf.mxu1 }
 0xabc   : >> { %v2685_v59 = vadd.f32 %v3091_v34, %v2684_v31 }
 0xabe   : >> { %2704 = vst.msk [vmem:[%s4544_s26 + $0x78] sm:$0xff] %vm2688_vm3, %v2685_v59 }
 0xabf PF: > { %s27_s24 = sadd.s32 1, %s3230_s24  }
 0xac0   : > { %p24_p5 = scmp.ge.s32.totalorder %s27_s24, 6  }
 0xac2   :  { %26 = sbr.rel (!%p24_p5) target bundleno = 3 (0x3), region = 139 }

</bundles_post_ra>
